<compile_context>
chip_gen: v6e
topology: v6e:2x2x1
jax: 0.10.0
libtpu: 0.0.40
codegen_flags: <defaults>
</compile_context>

<pallas_src>
import functools

import jax
import jax.numpy as jnp
import numpy as np
from jax import lax
from jax.experimental import pallas as pl
from jax.experimental.pallas import tpu as pltpu


def _conv_taps(src, mask, w_ref, bias_ref, *, W, K, pad, n_lanes, relu):
    """3x3 'SAME' conv on lane-flattened planes.

    src:   (C_in, n_lanes) with n_lanes = NB*H*W (NB images concatenated)
    mask:  (K*K, n_lanes)  per-tap validity (zero-padding emulation, per image)
    w_ref: (K*K, C_out, C_in) per-tap weight slices
    Each tap: masked lane-roll (XLU) + one small MXU matmul, accumulated f32.
    """
    acc = None
    for t in range(K * K):
        dy = t // K - pad
        dx = t % K - pad
        shift = (-(dy * W + dx)) % n_lanes            # jnp.roll-style shift
        shifted = pltpu.roll(src, shift, axis=1) if shift else src
        # centre tap is always in-bounds: skip the mask multiply (v5e VPU win)
        tap = shifted if (dy == 0 and dx == 0) else shifted * mask[t:t + 1, :]
        part = jnp.dot(w_ref[t], tap, preferred_element_type=jnp.float32)
        acc = part if acc is None else acc + part
    acc = acc + bias_ref[...]                         # (C_out, 1) broadcast
    return jnp.maximum(acc, 0.0) if relu else acc


def _residual_conv_kernel(x_ref, mask_ref, lnw_ref, lnb_ref, w1_ref, b1_ref,
                          w2_ref, b2_ref, o_ref, *, H, W, K, nb, eps):
    pad = (K - 1) // 2
    HW = H * W
    L = nb * HW
    inv_hw = 1.0 / HW

    x = x_ref[...]                                    # (C_in, NB*HW)
    mask = mask_ref[...]                              # (K*K, NB*HW)

    # ---- LayerNorm over each image's (H, W) plane (HW-lane segments). ----
    # sum & sum-of-squares -> the two cross-lane reductions are independent.
    segs = []
    for b in range(nb):
        xs = x[:, b * HW:(b + 1) * HW]                # lane-aligned slice
        s1 = jnp.sum(xs, axis=-1, keepdims=True)      # (C_in, 1)
        s2 = jnp.sum(xs * xs, axis=-1, keepdims=True)
        mu = s1 * inv_hw
        var = s2 * inv_hw - mu * mu
        segs.append((xs - mu) * lax.rsqrt(var + eps))
    xn = segs[0] if nb == 1 else jnp.concatenate(segs, axis=-1)
    xn = xn * lnw_ref[...] + lnb_ref[...]             # (1, L) affine, bcast C

    # ---- conv1 (+bias, ReLU) and conv2 (+bias) ----
    h = _conv_taps(xn, mask, w1_ref, b1_ref, W=W, K=K, pad=pad,
                   n_lanes=L, relu=True)              # (C_hid, L)
    y = _conv_taps(h, mask, w2_ref, b2_ref, W=W, K=K, pad=pad,
                   n_lanes=L, relu=False)             # (C_in, L)

    # ---- residual with the pre-norm input ----
    o_ref[...] = y + x


def residual_convolutional(x_nchw, params, *, kernel_size=3, eps=1e-5,
                           images_per_step=None, lane_target=1024):
    """Pallas implementation of ResidualConvolutional.forward (NCHW in/out)."""
    N, C, H, W = x_nchw.shape
    K = kernel_size
    assert (K - 1) % 2 == 0, "odd kernel size required"
    pad = (K - 1) // 2
    HW = H * W
    C_hid = params["b1"].shape[0]

    # Images per grid step (NB): widen the matmul lane axis up to lane_target,
    # but keep >= 2 grid steps when N >= 2 so v7x's two TensorCores both get
    # work on the "parallel" axis.  Per-step VMEM footprint is a few hundred
    # KiB at these sizes, far below v7x's 64 MiB / v5e-v6e's 128 MiB.
    if images_per_step is None:
        nb = max(1, min(N, lane_target // HW))
        while nb > 1 and (N % nb != 0 or N // nb < 2):
            nb -= 1
    else:
        nb = int(images_per_step)
    assert N % nb == 0, "images_per_step must divide the batch"
    L = nb * HW

    # Lane-dense layout (C, N*HW): one transpose outside the kernel.
    x2 = jnp.transpose(x_nchw.astype(jnp.float32).reshape(N, C, HW),
                       (1, 0, 2)).reshape(C, N * HW)

    # Per-tap validity mask (zero-padding emulation), tiled per image so
    # cross-image wraparound taps are zeroed.
    ys = jnp.arange(H)[:, None]
    xs = jnp.arange(W)[None, :]
    rows = []
    for ky in range(K):
        for kx in range(K):
            dy, dx = ky - pad, kx - pad
            m = ((ys + dy >= 0) & (ys + dy < H) &
                 (xs + dx >= 0) & (xs + dx < W))
            rows.append(m.reshape(HW))
    mask = jnp.tile(jnp.stack(rows).astype(jnp.float32), (1, nb))  # (K*K, L)

    lnw = jnp.tile(params["ln_w"].astype(jnp.float32).reshape(1, HW), (1, nb))
    lnb = jnp.tile(params["ln_b"].astype(jnp.float32).reshape(1, HW), (1, nb))

    # Per-tap weight slices: PyTorch (O, I, kH, kW) -> (K*K, O, I).
    w1t = jnp.transpose(params["w1"].astype(jnp.float32),
                        (2, 3, 0, 1)).reshape(K * K, C_hid, C)
    w2t = jnp.transpose(params["w2"].astype(jnp.float32),
                        (2, 3, 0, 1)).reshape(K * K, C, C_hid)
    b1 = params["b1"].astype(jnp.float32).reshape(C_hid, 1)
    b2 = params["b2"].astype(jnp.float32).reshape(C, 1)

    kernel = functools.partial(_residual_conv_kernel,
                               H=H, W=W, K=K, nb=nb, eps=eps)

    out2 = pl.pallas_call(
        kernel,
        out_shape=jax.ShapeDtypeStruct((C, N * HW), jnp.float32),
        grid_spec=pltpu.PrefetchScalarGridSpec(
            num_scalar_prefetch=0,
            grid=(N // nb,),
            in_specs=[
                pl.BlockSpec((C, L), lambda i: (0, i)),               # x
                pl.BlockSpec((K * K, L), lambda i: (0, 0)),           # mask
                pl.BlockSpec((1, L), lambda i: (0, 0)),               # ln_w
                pl.BlockSpec((1, L), lambda i: (0, 0)),               # ln_b
                pl.BlockSpec((K * K, C_hid, C), lambda i: (0, 0, 0)),  # w1
                pl.BlockSpec((C_hid, 1), lambda i: (0, 0)),           # b1
                pl.BlockSpec((K * K, C, C_hid), lambda i: (0, 0, 0)),  # w2
                pl.BlockSpec((C, 1), lambda i: (0, 0)),               # b2
            ],
            out_specs=pl.BlockSpec((C, L), lambda i: (0, i)),
        ),
        compiler_params=pltpu.CompilerParams(
            dimension_semantics=("parallel",),          # images independent
            vmem_limit_bytes=32 * 1024 * 1024),         # explicit, safe on all
    )(x2, mask, lnw, lnb, w1t, b1, w2t, b2)

    # glue back to NCHW
    return jnp.transpose(out2.reshape(C, N, HW), (1, 0, 2)).reshape(N, C, H, W)


def reference(x_nchw, params, eps=1e-5):
    """Pure-JAX reference matching the PyTorch module exactly."""
    mu = jnp.mean(x_nchw, axis=(2, 3), keepdims=True)
    var = jnp.mean((x_nchw - mu) ** 2, axis=(2, 3), keepdims=True)
    xn = (x_nchw - mu) / jnp.sqrt(var + eps)
    xn = xn * params["ln_w"][None, None] + params["ln_b"][None, None]
    h = lax.conv_general_dilated(xn, params["w1"], (1, 1), "SAME",
                                 dimension_numbers=("NCHW", "OIHW", "NCHW"))
    h = jnp.maximum(h + params["b1"][None, :, None, None], 0.0)
    y = lax.conv_general_dilated(h, params["w2"], (1, 1), "SAME",
                                 dimension_numbers=("NCHW", "OIHW", "NCHW"))
    y = y + params["b2"][None, :, None, None]
    return y + x_nchw


if __name__ == "__main__":
    # small shapes consistent with the module defaults
    N, C, H, W = 2, 4, 16, 16
    C_hid, K = 12, 3

    key = jax.random.PRNGKey(0)
    kx, k1, k2, k3, k4, k5, k6 = jax.random.split(key, 7)

    x = jax.random.normal(kx, (N, C, H, W), jnp.float32)

    params = {
        # LayerNorm((H, W)): elementwise affine over the spatial plane
        "ln_w": 1.0 + 0.1 * jax.random.normal(k1, (H, W), jnp.float32),
        "ln_b": 0.1 * jax.random.normal(k2, (H, W), jnp.float32),
        # Conv2d(C -> C_hid, K, padding=1), PyTorch weight layout (O, I, kH, kW)
        "w1": 0.2 * jax.random.normal(k3, (C_hid, C, K, K), jnp.float32),
        "b1": 0.1 * jax.random.normal(k4, (C_hid,), jnp.float32),
        # Conv2d(C_hid -> C, K, padding=1)
        "w2": 0.2 * jax.random.normal(k5, (C, C_hid, K, K), jnp.float32),
        "b2": 0.1 * jax.random.normal(k6, (C,), jnp.float32),
    }

    ref = jax.block_until_ready(reference(x, params))

    # Default heuristic: 2 grid steps x 1 image (keeps both v7x TCs busy).
    out = jax.block_until_ready(residual_convolutional(x, params))
    assert out.shape == x.shape and out.dtype == jnp.float32
    np.testing.assert_allclose(np.asarray(out), np.asarray(ref),
                               rtol=1e-4, atol=1e-4)

    # Lane-batched path: 1 grid step, 2 images on the matmul lane axis.
    out_b = jax.block_until_ready(
        residual_convolutional(x, params, images_per_step=2))
    np.testing.assert_allclose(np.asarray(out_b), np.asarray(ref),
                               rtol=1e-4, atol=1e-4)

    print("KERNEL_OK")
</pallas_src>

<mosaic_0001>
module attributes {stable_mosaic.version = 11 : i64} {
  func.func @_residual_conv_kernel(%arg0: i32, %arg1: memref<4x256xf32, #tpu.memory_space<vmem>>, %arg2: memref<9x256xf32, #tpu.memory_space<vmem>>, %arg3: memref<1x256xf32, #tpu.memory_space<vmem>>, %arg4: memref<1x256xf32, #tpu.memory_space<vmem>>, %arg5: memref<9x12x4xf32, #tpu.memory_space<vmem>>, %arg6: memref<12x1xf32, #tpu.memory_space<vmem>>, %arg7: memref<9x4x12xf32, #tpu.memory_space<vmem>>, %arg8: memref<4x1xf32, #tpu.memory_space<vmem>>, %arg9: memref<4x256xf32, #tpu.memory_space<vmem>>) attributes {dimension_semantics = [#tpu.dimension_semantics<parallel>], iteration_bounds = array<i64: 2>, scalar_prefetch = 0 : i64, scratch_operands = 0 : i64, tpu.core_type = #tpu.core_type<tc>, window_params = [{transform_indices = @transform_0, window_bounds = array<i64: 4, 256>}, {pipeline_mode = #tpu.pipeline_mode<synchronous>, transform_indices = @transform_1, window_bounds = array<i64: 9, 256>}, {pipeline_mode = #tpu.pipeline_mode<synchronous>, transform_indices = @transform_2, window_bounds = array<i64: 1, 256>}, {pipeline_mode = #tpu.pipeline_mode<synchronous>, transform_indices = @transform_3, window_bounds = array<i64: 1, 256>}, {pipeline_mode = #tpu.pipeline_mode<synchronous>, transform_indices = @transform_4, window_bounds = array<i64: 9, 12, 4>}, {pipeline_mode = #tpu.pipeline_mode<synchronous>, transform_indices = @transform_5, window_bounds = array<i64: 12, 1>}, {pipeline_mode = #tpu.pipeline_mode<synchronous>, transform_indices = @transform_6, window_bounds = array<i64: 9, 4, 12>}, {pipeline_mode = #tpu.pipeline_mode<synchronous>, transform_indices = @transform_7, window_bounds = array<i64: 4, 1>}, {transform_indices = @transform_8, window_bounds = array<i64: 4, 256>}]} {
    %c0 = arith.constant 0 : index
    %c0_0 = arith.constant 0 : index
    %0 = vector.load %arg1[%c0, %c0_0] : memref<4x256xf32, #tpu.memory_space<vmem>>, vector<4x256xf32>
    %c0_1 = arith.constant 0 : index
    %c0_2 = arith.constant 0 : index
    %1 = vector.load %arg2[%c0_1, %c0_2] : memref<9x256xf32, #tpu.memory_space<vmem>>, vector<9x256xf32>
    %cst = arith.constant dense<0.000000e+00> : vector<4xf32>
    %2 = vector.multi_reduction <add>, %0, %cst [1] : vector<4x256xf32> to vector<4xf32>
    %3 = vector.shape_cast %2 : vector<4xf32> to vector<4x1xf32>
    %4 = arith.mulf %0, %0 : vector<4x256xf32>
    %cst_3 = arith.constant dense<0.000000e+00> : vector<4xf32>
    %5 = vector.multi_reduction <add>, %4, %cst_3 [1] : vector<4x256xf32> to vector<4xf32>
    %6 = vector.shape_cast %5 : vector<4xf32> to vector<4x1xf32>
    %cst_4 = arith.constant 3.906250e-03 : f32
    %7 = vector.broadcast %cst_4 : f32 to vector<4x1xf32>
    %8 = arith.mulf %3, %7 : vector<4x1xf32>
    %cst_5 = arith.constant 3.906250e-03 : f32
    %9 = vector.broadcast %cst_5 : f32 to vector<4x1xf32>
    %10 = arith.mulf %6, %9 : vector<4x1xf32>
    %11 = arith.mulf %8, %8 : vector<4x1xf32>
    %12 = arith.subf %10, %11 : vector<4x1xf32>
    %13 = vector.broadcast %8 : vector<4x1xf32> to vector<4x256xf32>
    %14 = arith.subf %0, %13 : vector<4x256xf32>
    %cst_6 = arith.constant 9.99999974E-6 : f32
    %15 = vector.broadcast %cst_6 : f32 to vector<4x1xf32>
    %16 = arith.addf %12, %15 : vector<4x1xf32>
    %17 = math.rsqrt %16 : vector<4x1xf32>
    %18 = vector.broadcast %17 : vector<4x1xf32> to vector<4x256xf32>
    %19 = arith.mulf %14, %18 : vector<4x256xf32>
    %c0_7 = arith.constant 0 : index
    %c0_8 = arith.constant 0 : index
    %20 = vector.load %arg3[%c0_7, %c0_8] : memref<1x256xf32, #tpu.memory_space<vmem>>, vector<1x256xf32>
    %21 = vector.broadcast %20 : vector<1x256xf32> to vector<4x256xf32>
    %22 = arith.mulf %19, %21 : vector<4x256xf32>
    %c0_9 = arith.constant 0 : index
    %c0_10 = arith.constant 0 : index
    %23 = vector.load %arg4[%c0_9, %c0_10] : memref<1x256xf32, #tpu.memory_space<vmem>>, vector<1x256xf32>
    %24 = vector.broadcast %23 : vector<1x256xf32> to vector<4x256xf32>
    %25 = arith.addf %22, %24 : vector<4x256xf32>
    %c17_i32 = arith.constant 17 : i32
    %26 = tpu.dynamic_rotate %25 by %c17_i32 dim 1 : vector<4x256xf32>, i32 -> vector<4x256xf32>
    %27 = vector.extract_strided_slice %1 {offsets = [0, 0], sizes = [1, 256], strides = [1, 1]} : vector<9x256xf32> to vector<1x256xf32>
    %28 = vector.broadcast %27 : vector<1x256xf32> to vector<4x256xf32>
    %29 = arith.mulf %26, %28 : vector<4x256xf32>
    %c0_11 = arith.constant 0 : index
    %c0_12 = arith.constant 0 : index
    %c0_13 = arith.constant 0 : index
    %30 = vector.load %arg5[%c0_11, %c0_12, %c0_13] : memref<9x12x4xf32, #tpu.memory_space<vmem>>, vector<1x12x4xf32>
    %31 = vector.shape_cast %30 : vector<1x12x4xf32> to vector<12x4xf32>
    %cst_14 = arith.constant dense<0.000000e+00> : vector<12x256xf32>
    %32 = tpu.matmul %31, %29, %cst_14 {dimension_numbers = #tpu.dot_dimension_numbers<[1], [0], [0], [1], [0, 0, 1, 1], [], []>} : vector<12x4xf32>, vector<4x256xf32>, vector<12x256xf32> -> vector<12x256xf32>
    %c16_i32 = arith.constant 16 : i32
    %33 = tpu.dynamic_rotate %25 by %c16_i32 dim 1 : vector<4x256xf32>, i32 -> vector<4x256xf32>
    %34 = vector.extract_strided_slice %1 {offsets = [1, 0], sizes = [1, 256], strides = [1, 1]} : vector<9x256xf32> to vector<1x256xf32>
    %35 = vector.broadcast %34 : vector<1x256xf32> to vector<4x256xf32>
    %36 = arith.mulf %33, %35 : vector<4x256xf32>
    %c1 = arith.constant 1 : index
    %c0_15 = arith.constant 0 : index
    %c0_16 = arith.constant 0 : index
    %37 = vector.load %arg5[%c1, %c0_15, %c0_16] : memref<9x12x4xf32, #tpu.memory_space<vmem>>, vector<1x12x4xf32>
    %38 = vector.shape_cast %37 : vector<1x12x4xf32> to vector<12x4xf32>
    %cst_17 = arith.constant dense<0.000000e+00> : vector<12x256xf32>
    %39 = tpu.matmul %38, %36, %cst_17 {dimension_numbers = #tpu.dot_dimension_numbers<[1], [0], [0], [1], [0, 0, 1, 1], [], []>} : vector<12x4xf32>, vector<4x256xf32>, vector<12x256xf32> -> vector<12x256xf32>
    %40 = arith.addf %32, %39 : vector<12x256xf32>
    %c15_i32 = arith.constant 15 : i32
    %41 = tpu.dynamic_rotate %25 by %c15_i32 dim 1 : vector<4x256xf32>, i32 -> vector<4x256xf32>
    %42 = vector.extract_strided_slice %1 {offsets = [2, 0], sizes = [1, 256], strides = [1, 1]} : vector<9x256xf32> to vector<1x256xf32>
    %43 = vector.broadcast %42 : vector<1x256xf32> to vector<4x256xf32>
    %44 = arith.mulf %41, %43 : vector<4x256xf32>
    %c2 = arith.constant 2 : index
    %c0_18 = arith.constant 0 : index
    %c0_19 = arith.constant 0 : index
    %45 = vector.load %arg5[%c2, %c0_18, %c0_19] : memref<9x12x4xf32, #tpu.memory_space<vmem>>, vector<1x12x4xf32>
    %46 = vector.shape_cast %45 : vector<1x12x4xf32> to vector<12x4xf32>
    %cst_20 = arith.constant dense<0.000000e+00> : vector<12x256xf32>
    %47 = tpu.matmul %46, %44, %cst_20 {dimension_numbers = #tpu.dot_dimension_numbers<[1], [0], [0], [1], [0, 0, 1, 1], [], []>} : vector<12x4xf32>, vector<4x256xf32>, vector<12x256xf32> -> vector<12x256xf32>
    %48 = arith.addf %40, %47 : vector<12x256xf32>
    %c1_i32 = arith.constant 1 : i32
    %49 = tpu.dynamic_rotate %25 by %c1_i32 dim 1 : vector<4x256xf32>, i32 -> vector<4x256xf32>
    %50 = vector.extract_strided_slice %1 {offsets = [3, 0], sizes = [1, 256], strides = [1, 1]} : vector<9x256xf32> to vector<1x256xf32>
    %51 = vector.broadcast %50 : vector<1x256xf32> to vector<4x256xf32>
    %52 = arith.mulf %49, %51 : vector<4x256xf32>
    %c3 = arith.constant 3 : index
    %c0_21 = arith.constant 0 : index
    %c0_22 = arith.constant 0 : index
    %53 = vector.load %arg5[%c3, %c0_21, %c0_22] : memref<9x12x4xf32, #tpu.memory_space<vmem>>, vector<1x12x4xf32>
    %54 = vector.shape_cast %53 : vector<1x12x4xf32> to vector<12x4xf32>
    %cst_23 = arith.constant dense<0.000000e+00> : vector<12x256xf32>
    %55 = tpu.matmul %54, %52, %cst_23 {dimension_numbers = #tpu.dot_dimension_numbers<[1], [0], [0], [1], [0, 0, 1, 1], [], []>} : vector<12x4xf32>, vector<4x256xf32>, vector<12x256xf32> -> vector<12x256xf32>
    %56 = arith.addf %48, %55 : vector<12x256xf32>
    %c4 = arith.constant 4 : index
    %c0_24 = arith.constant 0 : index
    %c0_25 = arith.constant 0 : index
    %57 = vector.load %arg5[%c4, %c0_24, %c0_25] : memref<9x12x4xf32, #tpu.memory_space<vmem>>, vector<1x12x4xf32>
    %58 = vector.shape_cast %57 : vector<1x12x4xf32> to vector<12x4xf32>
    %cst_26 = arith.constant dense<0.000000e+00> : vector<12x256xf32>
    %59 = tpu.matmul %58, %25, %cst_26 {dimension_numbers = #tpu.dot_dimension_numbers<[1], [0], [0], [1], [0, 0, 1, 1], [], []>} : vector<12x4xf32>, vector<4x256xf32>, vector<12x256xf32> -> vector<12x256xf32>
    %60 = arith.addf %56, %59 : vector<12x256xf32>
    %c255_i32 = arith.constant 255 : i32
    %61 = tpu.dynamic_rotate %25 by %c255_i32 dim 1 : vector<4x256xf32>, i32 -> vector<4x256xf32>
    %62 = vector.extract_strided_slice %1 {offsets = [5, 0], sizes = [1, 256], strides = [1, 1]} : vector<9x256xf32> to vector<1x256xf32>
    %63 = vector.broadcast %62 : vector<1x256xf32> to vector<4x256xf32>
    %64 = arith.mulf %61, %63 : vector<4x256xf32>
    %c5 = arith.constant 5 : index
    %c0_27 = arith.constant 0 : index
    %c0_28 = arith.constant 0 : index
    %65 = vector.load %arg5[%c5, %c0_27, %c0_28] : memref<9x12x4xf32, #tpu.memory_space<vmem>>, vector<1x12x4xf32>
    %66 = vector.shape_cast %65 : vector<1x12x4xf32> to vector<12x4xf32>
    %cst_29 = arith.constant dense<0.000000e+00> : vector<12x256xf32>
    %67 = tpu.matmul %66, %64, %cst_29 {dimension_numbers = #tpu.dot_dimension_numbers<[1], [0], [0], [1], [0, 0, 1, 1], [], []>} : vector<12x4xf32>, vector<4x256xf32>, vector<12x256xf32> -> vector<12x256xf32>
    %68 = arith.addf %60, %67 : vector<12x256xf32>
    %c241_i32 = arith.constant 241 : i32
    %69 = tpu.dynamic_rotate %25 by %c241_i32 dim 1 : vector<4x256xf32>, i32 -> vector<4x256xf32>
    %70 = vector.extract_strided_slice %1 {offsets = [6, 0], sizes = [1, 256], strides = [1, 1]} : vector<9x256xf32> to vector<1x256xf32>
    %71 = vector.broadcast %70 : vector<1x256xf32> to vector<4x256xf32>
    %72 = arith.mulf %69, %71 : vector<4x256xf32>
    %c6 = arith.constant 6 : index
    %c0_30 = arith.constant 0 : index
    %c0_31 = arith.constant 0 : index
    %73 = vector.load %arg5[%c6, %c0_30, %c0_31] : memref<9x12x4xf32, #tpu.memory_space<vmem>>, vector<1x12x4xf32>
    %74 = vector.shape_cast %73 : vector<1x12x4xf32> to vector<12x4xf32>
    %cst_32 = arith.constant dense<0.000000e+00> : vector<12x256xf32>
    %75 = tpu.matmul %74, %72, %cst_32 {dimension_numbers = #tpu.dot_dimension_numbers<[1], [0], [0], [1], [0, 0, 1, 1], [], []>} : vector<12x4xf32>, vector<4x256xf32>, vector<12x256xf32> -> vector<12x256xf32>
    %76 = arith.addf %68, %75 : vector<12x256xf32>
    %c240_i32 = arith.constant 240 : i32
    %77 = tpu.dynamic_rotate %25 by %c240_i32 dim 1 : vector<4x256xf32>, i32 -> vector<4x256xf32>
    %78 = vector.extract_strided_slice %1 {offsets = [7, 0], sizes = [1, 256], strides = [1, 1]} : vector<9x256xf32> to vector<1x256xf32>
    %79 = vector.broadcast %78 : vector<1x256xf32> to vector<4x256xf32>
    %80 = arith.mulf %77, %79 : vector<4x256xf32>
    %c7 = arith.constant 7 : index
    %c0_33 = arith.constant 0 : index
    %c0_34 = arith.constant 0 : index
    %81 = vector.load %arg5[%c7, %c0_33, %c0_34] : memref<9x12x4xf32, #tpu.memory_space<vmem>>, vector<1x12x4xf32>
    %82 = vector.shape_cast %81 : vector<1x12x4xf32> to vector<12x4xf32>
    %cst_35 = arith.constant dense<0.000000e+00> : vector<12x256xf32>
    %83 = tpu.matmul %82, %80, %cst_35 {dimension_numbers = #tpu.dot_dimension_numbers<[1], [0], [0], [1], [0, 0, 1, 1], [], []>} : vector<12x4xf32>, vector<4x256xf32>, vector<12x256xf32> -> vector<12x256xf32>
    %84 = arith.addf %76, %83 : vector<12x256xf32>
    %c239_i32 = arith.constant 239 : i32
    %85 = tpu.dynamic_rotate %25 by %c239_i32 dim 1 : vector<4x256xf32>, i32 -> vector<4x256xf32>
    %86 = vector.extract_strided_slice %1 {offsets = [8, 0], sizes = [1, 256], strides = [1, 1]} : vector<9x256xf32> to vector<1x256xf32>
    %87 = vector.broadcast %86 : vector<1x256xf32> to vector<4x256xf32>
    %88 = arith.mulf %85, %87 : vector<4x256xf32>
    %c8 = arith.constant 8 : index
    %c0_36 = arith.constant 0 : index
    %c0_37 = arith.constant 0 : index
    %89 = vector.load %arg5[%c8, %c0_36, %c0_37] : memref<9x12x4xf32, #tpu.memory_space<vmem>>, vector<1x12x4xf32>
    %90 = vector.shape_cast %89 : vector<1x12x4xf32> to vector<12x4xf32>
    %cst_38 = arith.constant dense<0.000000e+00> : vector<12x256xf32>
    %91 = tpu.matmul %90, %88, %cst_38 {dimension_numbers = #tpu.dot_dimension_numbers<[1], [0], [0], [1], [0, 0, 1, 1], [], []>} : vector<12x4xf32>, vector<4x256xf32>, vector<12x256xf32> -> vector<12x256xf32>
    %92 = arith.addf %84, %91 : vector<12x256xf32>
    %c0_39 = arith.constant 0 : index
    %c0_40 = arith.constant 0 : index
    %93 = vector.load %arg6[%c0_39, %c0_40] : memref<12x1xf32, #tpu.memory_space<vmem>>, vector<12x1xf32>
    %94 = vector.broadcast %93 : vector<12x1xf32> to vector<12x256xf32>
    %95 = arith.addf %92, %94 : vector<12x256xf32>
    %cst_41 = arith.constant 0.000000e+00 : f32
    %96 = vector.broadcast %cst_41 : f32 to vector<12x256xf32>
    %97 = arith.maximumf %95, %96 : vector<12x256xf32>
    %c17_i32_42 = arith.constant 17 : i32
    %98 = tpu.dynamic_rotate %97 by %c17_i32_42 dim 1 : vector<12x256xf32>, i32 -> vector<12x256xf32>
    %99 = vector.extract_strided_slice %1 {offsets = [0, 0], sizes = [1, 256], strides = [1, 1]} : vector<9x256xf32> to vector<1x256xf32>
    %100 = vector.broadcast %99 : vector<1x256xf32> to vector<12x256xf32>
    %101 = arith.mulf %98, %100 : vector<12x256xf32>
    %c0_43 = arith.constant 0 : index
    %c0_44 = arith.constant 0 : index
    %c0_45 = arith.constant 0 : index
    %102 = vector.load %arg7[%c0_43, %c0_44, %c0_45] : memref<9x4x12xf32, #tpu.memory_space<vmem>>, vector<1x4x12xf32>
    %103 = vector.shape_cast %102 : vector<1x4x12xf32> to vector<4x12xf32>
    %cst_46 = arith.constant dense<0.000000e+00> : vector<4x256xf32>
    %104 = tpu.matmul %103, %101, %cst_46 {dimension_numbers = #tpu.dot_dimension_numbers<[1], [0], [0], [1], [0, 0, 1, 1], [], []>} : vector<4x12xf32>, vector<12x256xf32>, vector<4x256xf32> -> vector<4x256xf32>
    %c16_i32_47 = arith.constant 16 : i32
    %105 = tpu.dynamic_rotate %97 by %c16_i32_47 dim 1 : vector<12x256xf32>, i32 -> vector<12x256xf32>
    %106 = vector.extract_strided_slice %1 {offsets = [1, 0], sizes = [1, 256], strides = [1, 1]} : vector<9x256xf32> to vector<1x256xf32>
    %107 = vector.broadcast %106 : vector<1x256xf32> to vector<12x256xf32>
    %108 = arith.mulf %105, %107 : vector<12x256xf32>
    %c1_48 = arith.constant 1 : index
    %c0_49 = arith.constant 0 : index
    %c0_50 = arith.constant 0 : index
    %109 = vector.load %arg7[%c1_48, %c0_49, %c0_50] : memref<9x4x12xf32, #tpu.memory_space<vmem>>, vector<1x4x12xf32>
    %110 = vector.shape_cast %109 : vector<1x4x12xf32> to vector<4x12xf32>
    %cst_51 = arith.constant dense<0.000000e+00> : vector<4x256xf32>
    %111 = tpu.matmul %110, %108, %cst_51 {dimension_numbers = #tpu.dot_dimension_numbers<[1], [0], [0], [1], [0, 0, 1, 1], [], []>} : vector<4x12xf32>, vector<12x256xf32>, vector<4x256xf32> -> vector<4x256xf32>
    %112 = arith.addf %104, %111 : vector<4x256xf32>
    %c15_i32_52 = arith.constant 15 : i32
    %113 = tpu.dynamic_rotate %97 by %c15_i32_52 dim 1 : vector<12x256xf32>, i32 -> vector<12x256xf32>
    %114 = vector.extract_strided_slice %1 {offsets = [2, 0], sizes = [1, 256], strides = [1, 1]} : vector<9x256xf32> to vector<1x256xf32>
    %115 = vector.broadcast %114 : vector<1x256xf32> to vector<12x256xf32>
    %116 = arith.mulf %113, %115 : vector<12x256xf32>
    %c2_53 = arith.constant 2 : index
    %c0_54 = arith.constant 0 : index
    %c0_55 = arith.constant 0 : index
    %117 = vector.load %arg7[%c2_53, %c0_54, %c0_55] : memref<9x4x12xf32, #tpu.memory_space<vmem>>, vector<1x4x12xf32>
    %118 = vector.shape_cast %117 : vector<1x4x12xf32> to vector<4x12xf32>
    %cst_56 = arith.constant dense<0.000000e+00> : vector<4x256xf32>
    %119 = tpu.matmul %118, %116, %cst_56 {dimension_numbers = #tpu.dot_dimension_numbers<[1], [0], [0], [1], [0, 0, 1, 1], [], []>} : vector<4x12xf32>, vector<12x256xf32>, vector<4x256xf32> -> vector<4x256xf32>
    %120 = arith.addf %112, %119 : vector<4x256xf32>
    %c1_i32_57 = arith.constant 1 : i32
    %121 = tpu.dynamic_rotate %97 by %c1_i32_57 dim 1 : vector<12x256xf32>, i32 -> vector<12x256xf32>
    %122 = vector.extract_strided_slice %1 {offsets = [3, 0], sizes = [1, 256], strides = [1, 1]} : vector<9x256xf32> to vector<1x256xf32>
    %123 = vector.broadcast %122 : vector<1x256xf32> to vector<12x256xf32>
    %124 = arith.mulf %121, %123 : vector<12x256xf32>
    %c3_58 = arith.constant 3 : index
    %c0_59 = arith.constant 0 : index
    %c0_60 = arith.constant 0 : index
    %125 = vector.load %arg7[%c3_58, %c0_59, %c0_60] : memref<9x4x12xf32, #tpu.memory_space<vmem>>, vector<1x4x12xf32>
    %126 = vector.shape_cast %125 : vector<1x4x12xf32> to vector<4x12xf32>
    %cst_61 = arith.constant dense<0.000000e+00> : vector<4x256xf32>
    %127 = tpu.matmul %126, %124, %cst_61 {dimension_numbers = #tpu.dot_dimension_numbers<[1], [0], [0], [1], [0, 0, 1, 1], [], []>} : vector<4x12xf32>, vector<12x256xf32>, vector<4x256xf32> -> vector<4x256xf32>
    %128 = arith.addf %120, %127 : vector<4x256xf32>
    %c4_62 = arith.constant 4 : index
    %c0_63 = arith.constant 0 : index
    %c0_64 = arith.constant 0 : index
    %129 = vector.load %arg7[%c4_62, %c0_63, %c0_64] : memref<9x4x12xf32, #tpu.memory_space<vmem>>, vector<1x4x12xf32>
    %130 = vector.shape_cast %129 : vector<1x4x12xf32> to vector<4x12xf32>
    %cst_65 = arith.constant dense<0.000000e+00> : vector<4x256xf32>
    %131 = tpu.matmul %130, %97, %cst_65 {dimension_numbers = #tpu.dot_dimension_numbers<[1], [0], [0], [1], [0, 0, 1, 1], [], []>} : vector<4x12xf32>, vector<12x256xf32>, vector<4x256xf32> -> vector<4x256xf32>
    %132 = arith.addf %128, %131 : vector<4x256xf32>
    %c255_i32_66 = arith.constant 255 : i32
    %133 = tpu.dynamic_rotate %97 by %c255_i32_66 dim 1 : vector<12x256xf32>, i32 -> vector<12x256xf32>
    %134 = vector.extract_strided_slice %1 {offsets = [5, 0], sizes = [1, 256], strides = [1, 1]} : vector<9x256xf32> to vector<1x256xf32>
    %135 = vector.broadcast %134 : vector<1x256xf32> to vector<12x256xf32>
    %136 = arith.mulf %133, %135 : vector<12x256xf32>
    %c5_67 = arith.constant 5 : index
    %c0_68 = arith.constant 0 : index
    %c0_69 = arith.constant 0 : index
    %137 = vector.load %arg7[%c5_67, %c0_68, %c0_69] : memref<9x4x12xf32, #tpu.memory_space<vmem>>, vector<1x4x12xf32>
    %138 = vector.shape_cast %137 : vector<1x4x12xf32> to vector<4x12xf32>
    %cst_70 = arith.constant dense<0.000000e+00> : vector<4x256xf32>
    %139 = tpu.matmul %138, %136, %cst_70 {dimension_numbers = #tpu.dot_dimension_numbers<[1], [0], [0], [1], [0, 0, 1, 1], [], []>} : vector<4x12xf32>, vector<12x256xf32>, vector<4x256xf32> -> vector<4x256xf32>
    %140 = arith.addf %132, %139 : vector<4x256xf32>
    %c241_i32_71 = arith.constant 241 : i32
    %141 = tpu.dynamic_rotate %97 by %c241_i32_71 dim 1 : vector<12x256xf32>, i32 -> vector<12x256xf32>
    %142 = vector.extract_strided_slice %1 {offsets = [6, 0], sizes = [1, 256], strides = [1, 1]} : vector<9x256xf32> to vector<1x256xf32>
    %143 = vector.broadcast %142 : vector<1x256xf32> to vector<12x256xf32>
    %144 = arith.mulf %141, %143 : vector<12x256xf32>
    %c6_72 = arith.constant 6 : index
    %c0_73 = arith.constant 0 : index
    %c0_74 = arith.constant 0 : index
    %145 = vector.load %arg7[%c6_72, %c0_73, %c0_74] : memref<9x4x12xf32, #tpu.memory_space<vmem>>, vector<1x4x12xf32>
    %146 = vector.shape_cast %145 : vector<1x4x12xf32> to vector<4x12xf32>
    %cst_75 = arith.constant dense<0.000000e+00> : vector<4x256xf32>
    %147 = tpu.matmul %146, %144, %cst_75 {dimension_numbers = #tpu.dot_dimension_numbers<[1], [0], [0], [1], [0, 0, 1, 1], [], []>} : vector<4x12xf32>, vector<12x256xf32>, vector<4x256xf32> -> vector<4x256xf32>
    %148 = arith.addf %140, %147 : vector<4x256xf32>
    %c240_i32_76 = arith.constant 240 : i32
    %149 = tpu.dynamic_rotate %97 by %c240_i32_76 dim 1 : vector<12x256xf32>, i32 -> vector<12x256xf32>
    %150 = vector.extract_strided_slice %1 {offsets = [7, 0], sizes = [1, 256], strides = [1, 1]} : vector<9x256xf32> to vector<1x256xf32>
    %151 = vector.broadcast %150 : vector<1x256xf32> to vector<12x256xf32>
    %152 = arith.mulf %149, %151 : vector<12x256xf32>
    %c7_77 = arith.constant 7 : index
    %c0_78 = arith.constant 0 : index
    %c0_79 = arith.constant 0 : index
    %153 = vector.load %arg7[%c7_77, %c0_78, %c0_79] : memref<9x4x12xf32, #tpu.memory_space<vmem>>, vector<1x4x12xf32>
    %154 = vector.shape_cast %153 : vector<1x4x12xf32> to vector<4x12xf32>
    %cst_80 = arith.constant dense<0.000000e+00> : vector<4x256xf32>
    %155 = tpu.matmul %154, %152, %cst_80 {dimension_numbers = #tpu.dot_dimension_numbers<[1], [0], [0], [1], [0, 0, 1, 1], [], []>} : vector<4x12xf32>, vector<12x256xf32>, vector<4x256xf32> -> vector<4x256xf32>
    %156 = arith.addf %148, %155 : vector<4x256xf32>
    %c239_i32_81 = arith.constant 239 : i32
    %157 = tpu.dynamic_rotate %97 by %c239_i32_81 dim 1 : vector<12x256xf32>, i32 -> vector<12x256xf32>
    %158 = vector.extract_strided_slice %1 {offsets = [8, 0], sizes = [1, 256], strides = [1, 1]} : vector<9x256xf32> to vector<1x256xf32>
    %159 = vector.broadcast %158 : vector<1x256xf32> to vector<12x256xf32>
    %160 = arith.mulf %157, %159 : vector<12x256xf32>
    %c8_82 = arith.constant 8 : index
    %c0_83 = arith.constant 0 : index
    %c0_84 = arith.constant 0 : index
    %161 = vector.load %arg7[%c8_82, %c0_83, %c0_84] : memref<9x4x12xf32, #tpu.memory_space<vmem>>, vector<1x4x12xf32>
    %162 = vector.shape_cast %161 : vector<1x4x12xf32> to vector<4x12xf32>
    %cst_85 = arith.constant dense<0.000000e+00> : vector<4x256xf32>
    %163 = tpu.matmul %162, %160, %cst_85 {dimension_numbers = #tpu.dot_dimension_numbers<[1], [0], [0], [1], [0, 0, 1, 1], [], []>} : vector<4x12xf32>, vector<12x256xf32>, vector<4x256xf32> -> vector<4x256xf32>
    %164 = arith.addf %156, %163 : vector<4x256xf32>
    %c0_86 = arith.constant 0 : index
    %c0_87 = arith.constant 0 : index
    %165 = vector.load %arg8[%c0_86, %c0_87] : memref<4x1xf32, #tpu.memory_space<vmem>>, vector<4x1xf32>
    %166 = vector.broadcast %165 : vector<4x1xf32> to vector<4x256xf32>
    %167 = arith.addf %164, %166 : vector<4x256xf32>
    %168 = arith.addf %167, %0 : vector<4x256xf32>
    %c0_88 = arith.constant 0 : index
    %c0_89 = arith.constant 0 : index
    %169 = vector.load %arg9[%c0_88, %c0_89] : memref<4x256xf32, #tpu.memory_space<vmem>>, vector<4x256xf32>
    tpu.vector_store %arg9[%c0_88, %c0_89], %168 {strides = array<i32>} : memref<4x256xf32, #tpu.memory_space<vmem>>, vector<4x256xf32>,
    return
  }
  func.func @transform_0(%arg0: i32) -> (i32, i32) {
    %c0_i32 = arith.constant 0 : i32
    %c0_i32_0 = arith.constant 0 : i32
    return %c0_i32, %arg0 : i32, i32
  }
  func.func @transform_1(%arg0: i32) -> (i32, i32) {
    %c0_i32 = arith.constant 0 : i32
    %c0_i32_0 = arith.constant 0 : i32
    %c0_i32_1 = arith.constant 0 : i32
    return %c0_i32, %c0_i32_0 : i32, i32
  }
  func.func @transform_2(%arg0: i32) -> (i32, i32) {
    %c0_i32 = arith.constant 0 : i32
    %c0_i32_0 = arith.constant 0 : i32
    %c0_i32_1 = arith.constant 0 : i32
    return %c0_i32, %c0_i32_0 : i32, i32
  }
  func.func @transform_3(%arg0: i32) -> (i32, i32) {
    %c0_i32 = arith.constant 0 : i32
    %c0_i32_0 = arith.constant 0 : i32
    %c0_i32_1 = arith.constant 0 : i32
    return %c0_i32, %c0_i32_0 : i32, i32
  }
  func.func @transform_4(%arg0: i32) -> (i32, i32, i32) {
    %c0_i32 = arith.constant 0 : i32
    %c0_i32_0 = arith.constant 0 : i32
    %c0_i32_1 = arith.constant 0 : i32
    %c0_i32_2 = arith.constant 0 : i32
    return %c0_i32, %c0_i32_0, %c0_i32_1 : i32, i32, i32
  }
  func.func @transform_5(%arg0: i32) -> (i32, i32) {
    %c0_i32 = arith.constant 0 : i32
    %c0_i32_0 = arith.constant 0 : i32
    %c0_i32_1 = arith.constant 0 : i32
    return %c0_i32, %c0_i32_0 : i32, i32
  }
  func.func @transform_6(%arg0: i32) -> (i32, i32, i32) {
    %c0_i32 = arith.constant 0 : i32
    %c0_i32_0 = arith.constant 0 : i32
    %c0_i32_1 = arith.constant 0 : i32
    %c0_i32_2 = arith.constant 0 : i32
    return %c0_i32, %c0_i32_0, %c0_i32_1 : i32, i32, i32
  }
  func.func @transform_7(%arg0: i32) -> (i32, i32) {
    %c0_i32 = arith.constant 0 : i32
    %c0_i32_0 = arith.constant 0 : i32
    %c0_i32_1 = arith.constant 0 : i32
    return %c0_i32, %c0_i32_0 : i32, i32
  }
  func.func @transform_8(%arg0: i32) -> (i32, i32) {
    %c0_i32 = arith.constant 0 : i32
    %c0_i32_0 = arith.constant 0 : i32
    return %c0_i32, %arg0 : i32, i32
  }
}

</mosaic_0001>

<bundles_post_ra>
// kernel: tpu_custom_call.1
= control target key start
LH: loop header
LB: loop body
LE: loop exit
PB: predicated region body
PF: predicated region fallthrough
CT: control target
= control target key end

     0   :  { %13 = vsyncpa [#allocation3], 0  ;;  %s3299_s0 = inlined_call_operand.vmem [shape: f32[4,512], index: 0, kind: input, shape index: {}]   ;;  %s3300_s1 = inlined_call_operand.vmem [shape: f32[9,256], index: 1, kind: input, shape index: {}]   ;;  %s3301_s2 = inlined_call_operand.vmem [shape: f32[1,256], index: 2, kind: input, shape index: {}]   ;;  %s3302_s3 = inlined_call_operand.vmem [shape: f32[1,256], index: 3, kind: input, shape index: {}]   ;;  %s3303_s4 = inlined_call_operand.vmem [shape: f32[9,12,4], index: 4, kind: input, shape index: {}]   ;;  %s3304_s5 = inlined_call_operand.vmem [shape: f32[12,1], index: 5, kind: input, shape index: {}]   ;;  %s3305_s6 = inlined_call_operand.vmem [shape: f32[9,4,12], index: 6, kind: input, shape index: {}]   ;;  %s3306_s7 = inlined_call_operand.vmem [shape: f32[4,1], index: 7, kind: input, shape index: {}]   ;;  %s3307_s8 = inlined_call_operand.hbm [shape: f32[4,512], index: 8, kind: output, shape index: {}]  }
   0x1   :  { %15 = vsyncpa [#allocation3 + $0x1], 0  ;;  %s2643_s27 = smov 0   ;;  %s2645_s28 = smov 0  }
   0x2   :  { %s2647_s29 = smov 0   ;;  %s2649_s30 = smov 0  }
   0x3 LB: > { %s2664_s9 = sadd.s32 4294967295, %s2584_s30   ;;  %s2366_s10 = sadd.s32 4294967294, %s2584_s30   ;;  %s2584_s30 = sphi %s2649_s30, %s3325_s30   ;;  %s2580_s29 = sphi %s2647_s29, %s3324_s29   ;;  %s2576_s28 = sphi %s2645_s28, %s3323_s28   ;;  %s2572_s27 = sphi %s2643_s27, %s3322_s27  }
   0x4   : > { %s2668_s11 = sadd.s32 1, %s2584_s30   ;;  %s201_s12 = sadd.s32 1, %s2580_s29 }
   0x5   : > { %s198_s13 = ssub.s32 %s2584_s30, %s2668_s11  ;;  %p211_p0 = scmp.ne.s32.totalorder %s2580_s29, %s2576_s28 }
   0x6   : > { %p199_p1 = scmp.eq.s32.totalorder %s198_s13, 0  ;;  %p212_p2 = scmp.eq.s32.totalorder %s2664_s9, 1 }
   0x7   : > { %p217_p3 = scmp.ne.s32.totalorder %s2576_s28, %s2572_s27  ;;  %p218_p4 = scmp.eq.s32.totalorder %s2366_s10, 1 }
   0x8   : > { %s2679_s14 = scalar_select %p199_p1, %s2580_s29, %s201_s12  }
   0x9   : > { %p2681_p5 = por %p212_p2, %p211_p0  ;;  %p2685_p6 = por %p218_p4, %p217_p3 }
   0xa   : > { %p2369_p7 = scmp.ge.s32.totalorder %s2584_s30, 1  ;;  %p266_p8 = scmp.lt.s32.totalorder %s2584_s30, 3 }
   0xc   : > { %p267_p9 = pnand %p2369_p7, %p266_p8 }
   0xd   : > { %s2371_s17 = sshll.u32 (!%p267_p9), %s2664_s9, 1  ;;  %s2588_s26 = smov (!%p267_p9), 17  }
   0xe   : > { %270 = sbr.rel (%p267_p9) target bundleno = 961 (0x3c1), region = 52  ;;  %p301_p10 = scmp.lt.s32.totalorder (!%p267_p9), %s2371_s17, 3 }
   0xf   : > { %s2589_s10 = smov (!%p267_p9), 16   ;;  %s2590_s12 = smov (!%p267_p9), 15  }
  0x10   : > { %s3314_s13 = smov (!%p267_p9), 127   ;;  %s3312_s19 = smov (!%p267_p9), 111  }
  0x11   : > { %s2595_s20 = smov (!%p267_p9), 1  }
  0x13   : > { %s3327_s17 = smov (!%p301_p10, %s2371_s17), 3  ;;  %vm315_vm0 = vcmask 1043456   ;;  %v2586_v16 = vmov 839922192   ;;  %v338_v18 = vlaneseq  ;;  %v356_v25 = vld [vmem:[%s3301_s2] sm:$0x3] }
  0x14   : > { %s2372_s18 = sshll.u32 %s3327_s17, 2  ;;  %v336_v17 = vunpack.c.l.s4 %v2586_v16  ;;  %v369_v26 = vld [vmem:[%s3302_s3] sm:$0x3]  ;;  %v2587_v40 = vmov 0.0   ;;  %s3310_s17 = smov 113   ;;  %v2596_v43 = vmov 0  }
  0x15   : > { %s2695_s21 = scalar_lea.vmem %s3299_s0, %s2372_s18  ;;  %v2705_v21 = vshrl.u32 %v338_v18, 7  ;;  %503 = vmatprep.mubr.f32.mxu0 %v2587_v40  ;;  %592 = vmatprep.mubr.f32.mxu1 %v2587_v40  ;;  %s3308_s18 = smov 112   ;;  %v1377_v42 = vld [vmem:[%s3304_s5] sm:$0xff]  ;;  %v1378_v44 = vld [vmem:[%s3304_s5 + $0x8] sm:$0xf]  ;;  %v2766_v46 = vand.u32 127, %v338_v18 }
  0x16   : > { %v307_v0 = vld [vmem:[%s2695_s21] sm:$0xff]  ;;  %v337_v20 = vunpack.c.0.s8 %v336_v17  ;;  %2519 = vset.pattern.permute.xlu0 %v2596_v43  ;;  %2518 = vset.pattern.permute.xlu1 %v2596_v43  ;;  %v2776_v48 = vld [vmem:[%s3300_s1 + $0x8] sm:$0xff]  ;;  %v2373_v60 = vld [vmem:[%s3303_s4 + $0x10] sm:$0xff]  ;;  %vm426_vm3 = vcmask 31744   ;;  %vm1432_vm10 = vcmask 97280  }
  0x17   : > { %v2698_v1 = vcombine.high %v307_v0, %v307_v0  ;;  %v316_v2 = vsel %vm315_vm0, %v307_v0, 0.0  ;;  %v321_v3 = vmul.f32 %v307_v0, %v307_v0  ;;  %v2709_v23 = vsub.s32 0, %v2705_v21  ;;  %v2771_v47 = vld [vmem:[%s3300_s1] sm:$0xff]  ;;  %v405_v16 = vld [vmem:[%s3303_s4 + $0x8] sm:$0xf] }
  0x18   : > { %v340_v22 = vsub.s32 %v337_v20, %v2705_v21  ;;  %v364_v24 = vsub.s32 1, %v2705_v21  ;;  %vm410_vm1 = vcmp.lt.s32.totalorder %v2766_v46, 16  ;;  %vm391_vm2 = vcmp.lt.s32.totalorder %v2766_v46, 17  ;;  %v2390_v43 = vld [vmem:[%s3303_s4 + $0x38] sm:$0xf] }
  0x19   : > { %v317_v4 = vsel %vm315_vm0, %v2698_v1, 0.0  ;;  %v323_v5 = vcombine.high %v321_v3, %v321_v3  ;;  %v325_v6 = vsel %vm315_vm0, %v321_v3, 0.0  ;;  %v361_v28 = vrot.slane %v356_v25, %v2709_v23 }
  0x1a   : > { %v318_v7 = vadd.f32 %v317_v4, %v316_v2  ;;  %v365_v29 = vrot.slane %v356_v25, %v364_v24  ;;  %v374_v30 = vrot.slane %v369_v26, %v2709_v23  ;;  %v378_v31 = vrot.slane %v369_v26, %v364_v24 }
  0x1b   : > { %v326_v8 = vsel %vm315_vm0, %v323_v5, 0.0  ;;  %v2780_v50 = vrot.slane %v2771_v47, %v364_v24  ;;  %v2783_v51 = vrot.slane %v2776_v48, %v364_v24  ;;  %v2792_v55 = vrot.slane %v2771_v47, %v2709_v23 }
  0x1c   : > { %319 = vadd.xlane.f32.xlu0 %v318_v7  ;;  %v327_v9 = vadd.f32 %v326_v8, %v325_v6  ;;  %v366_v34 = vcombine.low %v361_v28, %v365_v29  ;;  %v379_v36 = vcombine.low %v374_v30, %v378_v31  ;;  %v2798_v58 = vrot.slane %v2776_v48, %v2709_v23  ;;  %v2374_v6 = vld [vmem:[%s3303_s4 + $0x18] sm:$0xf]  ;;  %v404_v7 = vld [vmem:[%s3303_s4] sm:$0xff]  ;;  %v2389_v31 = vld [vmem:[%s3303_s4 + $0x30] sm:$0xff] }
  0x1d   : > { %v614_v59 = vsub.s32 2, %v2705_v21  ;;  %vm609_vm4 = vcmp.lt.s32.totalorder %v2766_v46, 15  ;;  %vm722_vm5 = vcmp.lt.s32.totalorder %v2766_v46, 1  ;;  %v934_v20 = vsub.s32 5, %v2705_v21 }
  0x1e   : > { %vm929_vm6 = vcmp.lt.s32.totalorder %v2766_v46, 127  ;;  %v1047_v26 = vsub.s32 6, %v2705_v21  ;;  %vm1042_vm7 = vcmp.lt.s32.totalorder %v2766_v46, 113  ;;  %vm1155_vm8 = vcmp.lt.s32.totalorder %v2766_v46, 112 }
  0x1f   : > { %v2815_v4 = vrot.slane %v2771_v47, %v614_v59  ;;  %v2818_v5 = vrot.slane %v2776_v48, %v614_v59  ;;  %v2877_v29 = vrot.slane %v2771_v47, %v934_v20  ;;  %v2880_v30 = vrot.slane %v2776_v48, %v934_v20  ;;  %v2407_v59 = vld [vmem:[%s3303_s4 + $0x60] sm:$0xff] }
  0x20   : > { %328 = vadd.xlane.f32.xlu0 %v327_v9  ;;  %vm1268_vm9 = vcmp.lt.s32.totalorder %v2766_v46, 111 }
  0xa5   : > { %v320_v10 = vpop.xlane.xlu0 %319 }
  0xa6   : > { %v330_v11 = vmul.f32 0.00390625, %v320_v10 }
  0xa8   : > { %v332_v13 = vmul.f32 %v330_v11, %v330_v11  ;;  %v341_v27 = vrot.slane %v330_v11, %v340_v22 }
  0xa9   : > { %v329_v12 = vpop.xlane.xlu0 %328 }
  0xaa   : > { %v331_v14 = vmul.f32 0.00390625, %v329_v12  ;;  %v343_v33 = vsub.f32 %v307_v0, %v341_v27 }
  0xac   : > { %v333_v15 = vsub.f32 %v331_v14, %v332_v13  ;;  %v727_v13 = vsub.s32 3, %v2705_v21  ;;  %v2383_v14 = vld [vmem:[%s3303_s4 + $0x20] sm:$0xff] }
  0xae   : > { %v344_v19 = vadd.f32 1e-05, %v333_v15  ;;  %v2853_v18 = vrot.slane %v2771_v47, %v727_v13 }
  0xb0   : > { %2521 = vrsqrt.f32 %v344_v19  ;;  %v2856_v19 = vrot.slane %v2776_v48, %v727_v13  ;;  %v2413_v13 = vld [vmem:[%s3303_s4 + $0x70] sm:$0xff] }
  0xbd   : > { %v2522_v32 = vpop.eup %2521 }
  0xbe   : > { %v353_v35 = vrot.slane %v2522_v32, %v340_v22  ;;  %v2384_v22 = vld [vmem:[%s3303_s4 + $0x28] sm:$0xf]  ;;  %v2395_v32 = vld [vmem:[%s3303_s4 + $0x40] sm:$0xff] }
  0xc0   : > { %v355_v37 = vmul.f32 %v353_v35, %v343_v33 }
  0xc2   : > { %v368_v38 = vmul.f32 %v366_v34, %v355_v37  ;;  %v2896_v37 = vrot.slane %v2771_v47, %v1047_v26 }
  0xc4   : > { %v2720_v39 = vadd.f32 %v379_v36, %v368_v38  ;;  %v1160_v38 = vsub.s32 7, %v2705_v21  ;;  %v2396_v21 = vld [vmem:[%s3303_s4 + $0x48] sm:$0xf] }
  0xc6   : > { %385 = vrot.lane.b32.xlu0 %v2720_v39, %s2588_s26  ;;  %406 = vrot.lane.b32.xlu1 %v2720_v39, %s2589_s10  ;;  %v2730_v41 = vcombine.high %v2720_v39, %v2720_v39 }
  0xca   : > { %605 = vrot.lane.b32.xlu1 %v2720_v39, %s2590_s12  ;;  %927 = vrot.lane.b32.xlu0 %v2730_v41, %s3314_s13 }
  0xce   : > { %1040 = vrot.lane.b32.xlu0 %v2730_v41, %s3310_s17  ;;  %408 = vrot.lane.b32.xlu1 %v2730_v41, %s2589_s10 }
  0xd2   : > { %1153 = vrot.lane.b32.xlu0 %v2730_v41, %s3308_s18  ;;  %387 = vrot.lane.b32.xlu1 %v2730_v41, %s2588_s26 }
  0xd6   : > { %1266 = vrot.lane.b32.xlu0 %v2730_v41, %s3312_s19  ;;  %607 = vrot.lane.b32.xlu1 %v2730_v41, %s2590_s12 }
  0xda   : > { %718 = vrot.lane.b32.xlu1 %v2720_v39, %s2595_s20  ;;  %1381 = vperm.xlu0 %2519, %v1377_v42   ;;  %v2905_v42 = vrot.slane %v2776_v48, %v1047_v26 }
  0xde   : > { %720 = vrot.lane.b32.xlu1 %v2730_v41, %s2595_s20 }
  0xe2   : > { %925 = vrot.lane.b32.xlu1 %v2720_v39, %s3314_s13  ;;  %s3318_s13 = smov 127  }
  0xe6   : > { %1038 = vrot.lane.b32.xlu1 %v2720_v39, %s3310_s17  ;;  %s3320_s17 = smov 112  }
  0xea   : > { %1151 = vrot.lane.b32.xlu1 %v2720_v39, %s3308_s18 }
  0xee   : > { %1264 = vrot.lane.b32.xlu1 %v2720_v39, %s3312_s19  ;;  %s3319_s19 = smov 113  }
  0xf2   : > { %1386 = vperm.xlu1 %2518, %v1378_v44  }
 0x138   : > { %v407_v45 = vpop.permute.xlu1 %406  ;;  %v386_v61 = vpop.permute.xlu0 %385 }
 0x13c   : > { %v606_v49 = vpop.permute.xlu1 %605  ;;  %v928_v17 = vpop.permute.xlu0 %927 }
 0x140   : > { %v409_v52 = vpop.permute.xlu1 %408  ;;  %v1041_v33 = vpop.permute.xlu0 %1040 }
 0x141   : > { %v411_v53 = vsel %vm410_vm1, %v407_v45, %v409_v52  ;;  %v412_v54 = vsel %vm410_vm1, %v409_v52, %v407_v45  ;;  %v2922_v52 = vrot.slane %v2771_v47, %v1160_v38  ;;  %v2401_v47 = vld [vmem:[%s3303_s4 + $0x50] sm:$0xff] }
 0x142   : > { %v421_v56 = vmul.f32 %v2780_v50, %v412_v54  ;;  %v422_v57 = vmul.f32 %v2783_v51, %v411_v53 }
 0x144   : > { %2375 = vmatprep.subr.msk.mxu0 %vm315_vm0, %v422_v57  ;;  %v388_v62 = vpop.permute.xlu1 %387  ;;  %v1154_v53 = vpop.permute.xlu0 %1153  ;;  %v2930_v57 = vrot.slane %v2776_v48, %v1160_v38 }
 0x145   : > { %v392_v63 = vsel %vm391_vm2, %v386_v61, %v388_v62  ;;  %v393_v0 = vsel %vm391_vm2, %v388_v62, %v386_v61  ;;  %2376 = vmatpush1.msk.msra.mxu0 %vm315_vm0, %v421_v56 }
 0x146   : > { %v402_v2 = vmul.f32 %v2792_v55, %v393_v0  ;;  %2377 = vmatmul.mubr.msk.f32.vlgmr.msra.gmra.mxu0 %vm426_vm3, %v2373_v60  ;;  %v403_v3 = vmul.f32 %v2798_v58, %v392_v63  ;;  %v2953_v0 = vld [vmem:[%s3300_s1 + $0x10] ss:$0 sm:$0xff] }
 0x147   : > { %509 = vmatprep.mubr.f32.mxu0 %v2587_v40 }
 0x148   : > { %2379 = vmatprep.subr.msk.mxu1 %vm315_vm0, %v403_v3  ;;  %v608_v8 = vpop.permute.xlu1 %607  ;;  %v2402_v3 = vld [vmem:[%s3303_s4 + $0x58] sm:$0xf] }
 0x149   : > { %v610_v9 = vsel %vm609_vm4, %v606_v49, %v608_v8  ;;  %v611_v10 = vsel %vm609_vm4, %v608_v8, %v606_v49  ;;  %2380 = vmatpush1.msk.msra.mxu1 %vm315_vm0, %v402_v2  ;;  %v2959_v2 = vld [vmem:[%s3300_s1 + $0x18] ss:$0 sm:$0xff] }
 0x14a   : > { %v620_v11 = vmul.f32 %v2815_v4, %v611_v10  ;;  %v621_v12 = vmul.f32 %v2818_v5, %v610_v9  ;;  %2378 = vmatmul.mubr.msk.f32.gmra.mxu0 %vm426_vm3, %v2374_v6  ;;  %2381 = vmatmul.mubr.msk.f32.vlgmr.msra.gmra.mxu1 %vm426_vm3, %v404_v7  ;;  %v2408_v6 = vld [vmem:[%s3303_s4 + $0x68] sm:$0xf]  ;;  %v1267_v7 = vpop.permute.xlu0 %1266 }
 0x14b   : > { %701 = vmatprep.mubr.f32.mxu0 %v2587_v40  ;;  %598 = vmatprep.mubr.f32.mxu1 %v2587_v40 }
 0x14c   : > { %2385 = vmatprep.subr.msk.mxu0 %vm315_vm0, %v621_v12  ;;  %v719_v15 = vpop.permute.xlu1 %718 }
 0x14d   : > { %2386 = vmatpush1.msk.msra.mxu0 %vm315_vm0, %v620_v11 }
 0x14e   : > { %2387 = vmatmul.mubr.msk.f32.vlgmr.msra.gmra.mxu0 %vm426_vm3, %v2383_v14  ;;  %2397 = vmatprep.subr.msk.mxu0 %vm315_vm0, %v2730_v41  ;;  %v2421_v14 = vld [vmem:[%s3303_s4 + $0x80] sm:$0xff] }
 0x14f   : > { %2398 = vmatpush1.msk.msra.mxu0 %vm315_vm0, %v2720_v39  ;;  %2382 = vmatmul.mubr.msk.f32.gmra.mxu1 %vm426_vm3, %v405_v16  ;;  %v2422_v16 = vld [vmem:[%s3303_s4 + $0x88] sm:$0xf] }
 0x150   : > { %v721_v23 = vpop.permute.xlu1 %720  ;;  %707 = vmatprep.mubr.f32.mxu0 %v2587_v40  ;;  %814 = vmatprep.mubr.f32.mxu1 %v2587_v40 }
 0x151   : > { %v723_v24 = vsel %vm722_vm5, %v719_v15, %v721_v23  ;;  %v724_v25 = vsel %vm722_vm5, %v721_v23, %v719_v15  ;;  %v2414_v15 = vld [vmem:[%s3303_s4 + $0x78] sm:$0xf] }
 0x152   : > { %v733_v27 = vmul.f32 %v2853_v18, %v724_v25  ;;  %v734_v28 = vmul.f32 %v2856_v19, %v723_v24  ;;  %2388 = vmatmul.mubr.msk.f32.gmra.mxu0 %vm426_vm3, %v2384_v22 }
 0x153   : > { %908 = vmatprep.mubr.f32.mxu0 %v2587_v40 }
 0x154   : > { %2391 = vmatprep.subr.msk.mxu1 %vm315_vm0, %v734_v28  ;;  %v926_v34 = vpop.permute.xlu1 %925 }
 0x155   : > { %v930_v35 = vsel %vm929_vm6, %v926_v34, %v928_v17  ;;  %v931_v36 = vsel %vm929_vm6, %v928_v17, %v926_v34  ;;  %2392 = vmatpush1.msk.msra.mxu1 %vm315_vm0, %v733_v27 }
 0x156   : > { %v940_v39 = vmul.f32 %v2877_v29, %v930_v35  ;;  %v941_v41 = vmul.f32 %v2880_v30, %v931_v36  ;;  %2393 = vmatmul.mubr.msk.f32.vlgmr.msra.gmra.mxu1 %vm426_vm3, %v2389_v31  ;;  %2399 = vmatmul.mubr.msk.f32.vlgmr.msra.gmra.mxu0 %vm426_vm3, %v2395_v32 }
 0x157   : > { %820 = vmatprep.mubr.f32.mxu1 %v2587_v40  ;;  %914 = vmatprep.mubr.f32.mxu0 %v2587_v40 }
 0x158   : > { %2403 = vmatprep.subr.msk.mxu1 %vm315_vm0, %v941_v41  ;;  %v1039_v44 = vpop.permute.xlu1 %1038 }
 0x159   : > { %v1043_v45 = vsel %vm1042_vm7, %v1039_v44, %v1041_v33  ;;  %v1044_v49 = vsel %vm1042_vm7, %v1041_v33, %v1039_v44  ;;  %2404 = vmatpush1.msk.msra.mxu1 %vm315_vm0, %v940_v39 }
 0x15a   : > { %v1053_v54 = vmul.f32 %v2896_v37, %v1043_v45  ;;  %v1054_v56 = vmul.f32 %v2905_v42, %v1044_v49  ;;  %2394 = vmatmul.mubr.msk.f32.gmra.mxu1 %vm426_vm3, %v2390_v43  ;;  %2400 = vmatmul.mubr.msk.f32.gmra.mxu0 %vm426_vm3, %v2396_v21 }
 0x15b   : > { %1021 = vmatprep.mubr.f32.mxu1 %v2587_v40  ;;  %1134 = vmatprep.mubr.f32.mxu0 %v2587_v40 }
 0x15c   : > { %2409 = vmatprep.subr.msk.mxu0 %vm315_vm0, %v1054_v56  ;;  %v1152_v60 = vpop.permute.xlu1 %1151 }
 0x15d   : > { %v1156_v61 = vsel %vm1155_vm8, %v1152_v60, %v1154_v53  ;;  %v1157_v48 = vsel %vm1155_vm8, %v1154_v53, %v1152_v60  ;;  %2410 = vmatpush1.msk.msra.mxu0 %vm315_vm0, %v1053_v54 }
 0x15e   : > { %v1166_v62 = vmul.f32 %v2922_v52, %v1156_v61  ;;  %v1167_v63 = vmul.f32 %v2930_v57, %v1157_v48  ;;  %2405 = vmatmul.mubr.msk.f32.vlgmr.msra.gmra.mxu1 %vm426_vm3, %v2401_v47  ;;  %2411 = vmatmul.mubr.msk.f32.vlgmr.msra.gmra.mxu0 %vm426_vm3, %v2407_v59 }
 0x15f   : > { %1027 = vmatprep.mubr.f32.mxu1 %v2587_v40  ;;  %1140 = vmatprep.mubr.f32.mxu0 %v2587_v40 }
 0x160   : > { %2415 = vmatprep.subr.msk.mxu1 %vm315_vm0, %v1167_v63  ;;  %v1265_v8 = vpop.permute.xlu1 %1264 }
 0x161   : > { %v1269_v9 = vsel %vm1268_vm9, %v1265_v8, %v1267_v7  ;;  %v1270_v10 = vsel %vm1268_vm9, %v1267_v7, %v1265_v8  ;;  %2416 = vmatpush1.msk.msra.mxu1 %vm315_vm0, %v1166_v62 }
 0x162   : > { %v1279_v11 = vmul.f32 %v2953_v0, %v1269_v9  ;;  %v1280_v12 = vmul.f32 %v2959_v2, %v1270_v10  ;;  %2406 = vmatmul.mubr.msk.f32.gmra.mxu1 %vm426_vm3, %v2402_v3  ;;  %2412 = vmatmul.mubr.msk.f32.gmra.mxu0 %vm426_vm3, %v2408_v6 }
 0x163   : > { %1247 = vmatprep.mubr.f32.mxu1 %v2587_v40  ;;  %1360 = vmatprep.mubr.f32.mxu0 %v2587_v40 }
 0x164   : > { %2423 = vmatprep.subr.msk.mxu0 %vm315_vm0, %v1280_v12 }
 0x165   : > { %2424 = vmatpush1.msk.msra.mxu0 %vm315_vm0, %v1279_v11 }
 0x166   : > { %2417 = vmatmul.mubr.msk.f32.vlgmr.msra.gmra.mxu1 %vm426_vm3, %v2413_v13  ;;  %2425 = vmatmul.mubr.msk.f32.vlgmr.msra.gmra.mxu0 %vm426_vm3, %v2421_v14 }
 0x167   : > { %1253 = vmatprep.mubr.f32.mxu1 %v2587_v40  ;;  %1366 = vmatprep.mubr.f32.mxu0 %v2587_v40 }
 0x16a   : > { %2418 = vmatmul.mubr.msk.f32.gmra.mxu1 %vm426_vm3, %v2414_v15  ;;  %2426 = vmatmul.mubr.msk.f32.gmra.mxu0 %vm426_vm3, %v2422_v16  ;;  %v1382_v16 = vpop.permute.xlu0 %1381 }
 0x16b   : > { %1506 = vmatprep.mubr.f32.mxu1 %v2587_v40  ;;  %1684 = vmatprep.mubr.f32.mxu0 %v2587_v40 }
 0x206   : > { %v505_v17 = vpop.f32.mrf.mxu0 }
 0x208   : > { %v507_v20 = vpop.f32.mrf.mxu0 }
 0x20a   : > { %v511_v22 = vpop.f32.mrf.mxu0  ;;  %v594_v23 = vpop.f32.mrf.mxu1 }
 0x20b   : > { %v595_v36 = vadd.f32 %v594_v23, %v505_v17 }
 0x20c   : > { %v513_v24 = vpop.f32.mrf.mxu0  ;;  %v596_v25 = vpop.f32.mrf.mxu1 }
 0x20d   : > { %v597_v41 = vadd.f32 %v596_v25, %v507_v20 }
 0x20e   : > { %v703_v26 = vpop.f32.mrf.mxu0 }
 0x20f   : > { %v600_v27 = vpop.f32.mrf.mxu1  ;;  %v714_v43 = vadd.f32 %v703_v26, %v595_v36 }
 0x210   : > { %v705_v28 = vpop.f32.mrf.mxu0 }
 0x211   : > { %v602_v32 = vpop.f32.mrf.mxu1  ;;  %v715_v45 = vadd.f32 %v705_v28, %v597_v41  ;;  %v601_v28 = vadd.f32 %v600_v27, %v511_v22 }
 0x212   : > { %v709_v31 = vpop.f32.mrf.mxu0  ;;  %v603_v41 = vadd.f32 %v602_v32, %v513_v24 }
 0x213   : > { %v716_v36 = vadd.f32 %v709_v31, %v601_v28 }
 0x214   : > { %v711_v33 = vpop.f32.mrf.mxu0 }
 0x216   : > { %v816_v34 = vpop.f32.mrf.mxu1  ;;  %v910_v35 = vpop.f32.mrf.mxu0 }
 0x217   : > { %v827_v49 = vadd.f32 %v816_v34, %v714_v43  ;;  %v717_v43 = vadd.f32 %v711_v33, %v603_v41 }
 0x218   : > { %v818_v38 = vpop.f32.mrf.mxu1  ;;  %v912_v39 = vpop.f32.mrf.mxu0 }
 0x219   : > { %v828_v56 = vadd.f32 %v818_v38, %v715_v45  ;;  %v921_v60 = vadd.f32 %v910_v35, %v827_v49 }
 0x21a   : > { %v822_v21 = vpop.f32.mrf.mxu1  ;;  %v916_v44 = vpop.f32.mrf.mxu0 }
 0x21b   : > { %v922_v62 = vadd.f32 %v912_v39, %v828_v56  ;;  %v829_v39 = vadd.f32 %v822_v21, %v716_v36 }
 0x21c   : > { %v824_v53 = vpop.f32.mrf.mxu1  ;;  %v918_v54 = vpop.f32.mrf.mxu0 }
 0x21d   : > { %v923_v45 = vadd.f32 %v916_v44, %v829_v39  ;;  %v830_v22 = vadd.f32 %v824_v53, %v717_v43 }
 0x21e   : > { %v1023_v47 = vpop.f32.mrf.mxu1  ;;  %v1136_v59 = vpop.f32.mrf.mxu0 }
 0x21f   : > { %v1034_v63 = vadd.f32 %v1023_v47, %v921_v60  ;;  %v924_v21 = vadd.f32 %v918_v54, %v830_v22  ;;  %v1387_v54 = vpop.permute.xlu1 %1386 }
 0x220   : > { %v1025_v61 = vpop.f32.mrf.mxu1  ;;  %v1138_v48 = vpop.f32.mrf.mxu0 }
 0x221   : > { %v1035_v7 = vadd.f32 %v1025_v61, %v922_v62  ;;  %v1147_v10 = vadd.f32 %v1136_v59, %v1034_v63 }
 0x222   : > { %v1029_v3 = vpop.f32.mrf.mxu1  ;;  %v1142_v6 = vpop.f32.mrf.mxu0 }
 0x223   : > { %v1148_v13 = vadd.f32 %v1138_v48, %v1035_v7  ;;  %v1036_v27 = vadd.f32 %v1029_v3, %v923_v45  ;;  %v2277_v3 = vld [vmem:[%s3306_s7] sm:$0xf] }
 0x224   : > { %v1031_v8 = vpop.f32.mrf.mxu1  ;;  %v1144_v9 = vpop.f32.mrf.mxu0 }
 0x225   : > { %v1149_v49 = vadd.f32 %v1142_v6, %v1036_v27  ;;  %v1037_v24 = vadd.f32 %v1031_v8, %v924_v21 }
 0x226   : > { %v1249_v11 = vpop.f32.mrf.mxu1  ;;  %v1362_v12 = vpop.f32.mrf.mxu0 }
 0x227   : > { %v1260_v14 = vadd.f32 %v1249_v11, %v1147_v10  ;;  %v1150_v53 = vadd.f32 %v1144_v9, %v1037_v24 }
 0x228   : > { %v1251_v15 = vpop.f32.mrf.mxu1  ;;  %v1364_v23 = vpop.f32.mrf.mxu0 }
 0x229   : > { %v1261_v17 = vadd.f32 %v1251_v15, %v1148_v13  ;;  %v1373_v20 = vadd.f32 %v1362_v12, %v1260_v14 }
 0x22a   : > { %v1255_v31 = vpop.f32.mrf.mxu1  ;;  %v1368_v33 = vpop.f32.mrf.mxu0 }
 0x22b   : > { %v1389_v25 = vadd.f32 %v1382_v16, %v1373_v20  ;;  %v1374_v26 = vadd.f32 %v1364_v23, %v1261_v17  ;;  %v1262_v32 = vadd.f32 %v1255_v31, %v1149_v49 }
 0x22c   : > { %v1257_v44 = vpop.f32.mrf.mxu1  ;;  %v1370_v59 = vpop.f32.mrf.mxu0 }
 0x22d   : > { %v3003_v34 = vmax.f32 %v1389_v25, 0.0  ;;  %v1390_v35 = vadd.f32 %v1382_v16, %v1374_v26  ;;  %v1375_v56 = vadd.f32 %v1368_v33, %v1262_v32  ;;  %v1263_v47 = vadd.f32 %v1257_v44, %v1150_v53 }
 0x22f   : > { %v3005_v38 = vmax.f32 %v1390_v35, 0.0  ;;  %1414 = vrot.lane.b32.xlu0 %v3003_v34, %s2589_s10  ;;  %v1391_v60 = vadd.f32 %v1387_v54, %v1375_v56  ;;  %v1376_v61 = vadd.f32 %v1370_v59, %v1263_v47 }
 0x231   : > { %1418 = vrot.lane.b32.xlu1 %v3005_v38, %s2589_s10  ;;  %v3033_v48 = vmax.f32 %v1391_v60, 0.0  ;;  %v1392_v62 = vadd.f32 %v1387_v54, %v1376_v61 }
 0x233   : > { %1397 = vrot.lane.b32.xlu0 %v3003_v34, %s2588_s26  ;;  %v3041_v63 = vmax.f32 %v1392_v62, 0.0 }
 0x235   : > { %1401 = vrot.lane.b32.xlu1 %v3005_v38, %s2588_s26 }
 0x237   : > { %1593 = vrot.lane.b32.xlu0 %v3003_v34, %s2590_s12 }
 0x239   : > { %1597 = vrot.lane.b32.xlu1 %v3005_v38, %s2590_s12 }
 0x23b   : > { %1693 = vrot.lane.b32.xlu0 %v3003_v34, %s2595_s20 }
 0x23d   : > { %1697 = vrot.lane.b32.xlu1 %v3005_v38, %s2595_s20 }
 0x23f   : > { %1877 = vrot.lane.b32.xlu0 %v3003_v34, %s3318_s13 }
 0x241   : > { %1881 = vrot.lane.b32.xlu1 %v3005_v38, %s3318_s13 }
 0x243   : > { %1977 = vrot.lane.b32.xlu0 %v3003_v34, %s3319_s19 }
 0x245   : > { %1981 = vrot.lane.b32.xlu1 %v3005_v38, %s3319_s19 }
 0x247   : > { %2077 = vrot.lane.b32.xlu0 %v3003_v34, %s3320_s17 }
 0x249   : > { %2081 = vrot.lane.b32.xlu1 %v3005_v38, %s3320_s17 }
 0x24b   : > { %1399 = vrot.lane.b32.xlu0 %v3033_v48, %s2588_s26 }
 0x24d   : > { %1416 = vrot.lane.b32.xlu1 %v3033_v48, %s2589_s10 }
 0x24f   : > { %1595 = vrot.lane.b32.xlu0 %v3033_v48, %s2590_s12 }
 0x251   : > { %1420 = vrot.lane.b32.xlu1 %v3041_v63, %s2589_s10  ;;  %s3321_s10 = smov 111  }
 0x253   : > { %1695 = vrot.lane.b32.xlu0 %v3033_v48, %s2595_s20 }
 0x255   : > { %1403 = vrot.lane.b32.xlu1 %v3041_v63, %s2588_s26 }
 0x257   : > { %1879 = vrot.lane.b32.xlu0 %v3033_v48, %s3318_s13 }
 0x259   : > { %1599 = vrot.lane.b32.xlu1 %v3041_v63, %s2590_s12 }
 0x25b   : > { %1979 = vrot.lane.b32.xlu0 %v3033_v48, %s3319_s19 }
 0x25d   : > { %1699 = vrot.lane.b32.xlu1 %v3041_v63, %s2595_s20 }
 0x25f   : > { %2079 = vrot.lane.b32.xlu0 %v3033_v48, %s3320_s17 }
 0x261   : > { %1883 = vrot.lane.b32.xlu1 %v3041_v63, %s3318_s13  ;;  %s297_s13 = sand.u32 1, %s2576_s28  }
 0x262   : > { %s2293_s24 = scalar_lea.sflag [#allocation3], %s297_s13 }
 0x263   : > { %2179 = vrot.lane.b32.xlu0 %v3033_v48, %s3321_s10 }
 0x265   : > { %1983 = vrot.lane.b32.xlu1 %v3041_v63, %s3319_s19  ;;  %s2370_s19 = sshll.u32 %s297_s13, 3 }
 0x267   : > { %2177 = vrot.lane.b32.xlu0 %v3003_v34, %s3321_s10 }
 0x269   : > { %2083 = vrot.lane.b32.xlu1 %v3041_v63, %s3320_s17  ;;  %s2467_s17 = sshll.u32 %s2664_s9, 7  ;;  %s2597_s9 = smov [#allocation2]  }
 0x26a   : > { %s2305_s18 = scalar_lea.hbm %s3307_s8, %s2467_s17  ;;  %s2528_s22 = sshll.u32 %s2597_s9, 4  ;;  %s2529_s22 = int_to_ptr.vmem [resolvable:$false] %s2528_s22 }
 0x26b   : > { %2280 = vperm.xlu0 %2519, %v2277_v3  }
 0x26d   : > { %2183 = vrot.lane.b32.xlu1 %v3041_v63, %s3321_s10 }
 0x271   : > { %2181 = vrot.lane.b32.xlu1 %v3005_v38, %s3321_s10  ;;  %s299_s10 = scalar_lea.vmem [#allocation2], %s2370_s19 }
 0x272   : > { %s2307_s26 = sshll.u32 %s299_s10, 4  ;;  %s2308_s26 = int_to_ptr.vmem [resolvable:$true] %s2307_s26 }
 0x273   : > { %s2524_s25 = scalar_lea.vmem %s2308_s26, 128  ;;  %p2531_p0 = scmp.lt.s32.totalorder %s2308_s26, %s2529_s22 }
 0x274   : > { %p2525_p11 = scmp.ne.s32.totalorder %s2308_s26, %s2524_s25 }
 0x276   : > { %p2526_p12 = pnand %p2525_p11, %p2681_p5 }
 0x278   : > { %p2527_p13 = pneg %p2526_p12 }
 0x2a1   : > { %v1415_v6 = vpop.permute.xlu0 %1414 }
 0x2a3   : > { %v1419_v7 = vpop.permute.xlu1 %1418 }
 0x2a4   : > { %v1422_v36 = vsel %vm410_vm1, %v1415_v6, %v1419_v7  ;;  %v1424_v39 = vsel %vm410_vm1, %v1419_v7, %v1415_v6 }
 0x2a5   : > { %v1398_v8 = vpop.permute.xlu0 %1397  ;;  %v1426_v31 = vmul.f32 %v1424_v39, %v2780_v50  ;;  %v1427_v21 = vmul.f32 %v1422_v36, %v2783_v51 }
 0x2a7   : > { %v1402_v9 = vpop.permute.xlu1 %1401 }
 0x2a8   : > { %v1405_v24 = vsel %vm391_vm2, %v1398_v8, %v1402_v9  ;;  %v1407_v32 = vsel %vm391_vm2, %v1402_v9, %v1398_v8 }
 0x2a9   : > { %v1594_v10 = vpop.permute.xlu0 %1593  ;;  %v1409_v56 = vmul.f32 %v1407_v32, %v2792_v55  ;;  %v1410_v54 = vmul.f32 %v1405_v24, %v2798_v58 }
 0x2ab   : > { %v1598_v11 = vpop.permute.xlu1 %1597 }
 0x2ac   : > { %v1601_v47 = vsel %vm609_vm4, %v1594_v10, %v1598_v11  ;;  %v1603_v61 = vsel %vm609_vm4, %v1598_v11, %v1594_v10 }
 0x2ad   : > { %v1694_v12 = vpop.permute.xlu0 %1693  ;;  %v1605_v7 = vmul.f32 %v1603_v61, %v2815_v4  ;;  %v1606_v8 = vmul.f32 %v1601_v47, %v2818_v5 }
 0x2af   : > { %v1698_v13 = vpop.permute.xlu1 %1697 }
 0x2b0   : > { %v1701_v9 = vsel %vm722_vm5, %v1694_v12, %v1698_v13  ;;  %v1703_v11 = vsel %vm722_vm5, %v1698_v13, %v1694_v12  ;;  %v2434_v12 = vld [vmem:[%s3305_s6 + $0x8] sm:$0xf] }
 0x2b1   : > { %v3078_v14 = vpop.permute.xlu0 %1877  ;;  %v1705_v13 = vmul.f32 %v1703_v11, %v2853_v18 }
 0x2b3   : > { %v3080_v15 = vpop.permute.xlu1 %1881 }
 0x2b4   : > { %v1887_v39 = vsel %vm929_vm6, %v3080_v15, %v3078_v14 }
 0x2b5   : > { %v3082_v16 = vpop.permute.xlu0 %1977 }
 0x2b7   : > { %v3084_v17 = vpop.permute.xlu1 %1981 }
 0x2b9   : > { %v3086_v20 = vpop.permute.xlu0 %2077 }
 0x2bb   : > { %v3088_v23 = vpop.permute.xlu1 %2081 }
 0x2bc   : > { %v2087_v32 = vsel %vm1155_vm8, %v3088_v23, %v3086_v20 }
 0x2bd   : > { %v1400_v25 = vpop.permute.xlu0 %1399 }
 0x2bf   : > { %v1417_v26 = vpop.permute.xlu1 %1416 }
 0x2c1   : > { %v1596_v28 = vpop.permute.xlu0 %1595 }
 0x2c3   : > { %v1421_v35 = vpop.permute.xlu1 %1420 }
 0x2c4   : > { %v1423_v41 = vsel %vm410_vm1, %v1417_v26, %v1421_v35  ;;  %v1425_v43 = vsel %vm410_vm1, %v1421_v35, %v1417_v26  ;;  %v1706_v35 = vmul.f32 %v1701_v9, %v2856_v19 }
 0x2c5   : > { %v1428_v45 = vmul.f32 %v1425_v43, %v2780_v50  ;;  %v1429_v22 = vmul.f32 %v1423_v41, %v2783_v51  ;;  %v1696_v27 = vpop.permute.xlu0 %1695  ;;  %v2427_v50 = vld [vmem:[%s3305_s6 + $0x4] sm:$0xf] }
 0x2c7   : > { %2428 = vmatprep.subr.msk.mxu1 %vm315_vm0, %v1429_v22  ;;  %v1404_v49 = vpop.permute.xlu1 %1403  ;;  %v2442_v22 = vld [vmem:[%s3305_s6 + $0x10] sm:$0xf] }
 0x2c8   : > { %v1406_v33 = vsel %vm391_vm2, %v1400_v25, %v1404_v49  ;;  %v1408_v44 = vsel %vm391_vm2, %v1404_v49, %v1400_v25  ;;  %2429 = vmatpush1.msk.msra.mxu1 %vm315_vm0, %v1428_v45  ;;  %v1885_v45 = vsel %vm929_vm6, %v3078_v14, %v3080_v15 }
 0x2c9   : > { %v1411_v51 = vmul.f32 %v1408_v44, %v2792_v55  ;;  %v1412_v53 = vmul.f32 %v1406_v33, %v2798_v58  ;;  %1472 = vmatprep.subr.mxu1 %v1427_v21  ;;  %v1880_v59 = vpop.permute.xlu0 %1879  ;;  %v1413_v58 = vld [vmem:[%s3305_s6] sm:$0xf] }
 0x2ca   : > { %1473 = vmatpush1.msra.mxu1 %v1426_v31 }
 0x2cb   : > { %2431 = vmatprep.subr.msk.mxu1 %vm315_vm0, %v1412_v53  ;;  %v1600_v60 = vpop.permute.xlu1 %1599  ;;  %2430 = vmatmul.mubr.msk.f32.vlgmr.msra.gmra.mxu1 %vm1432_vm10, %v2427_v50 }
 0x2cc   : > { %v1602_v62 = vsel %vm609_vm4, %v1596_v28, %v1600_v60  ;;  %v1604_v55 = vsel %vm609_vm4, %v1600_v60, %v1596_v28  ;;  %2432 = vmatpush1.msk.msra.mxu1 %vm315_vm0, %v1411_v51  ;;  %1586 = vmatprep.mubr.f32.mxu1 %v2587_v40 }
 0x2cd   : > { %v1607_v3 = vmul.f32 %v1604_v55, %v2815_v4  ;;  %v1608_v6 = vmul.f32 %v1602_v62, %v2818_v5  ;;  %1552 = vmatprep.subr.mxu1 %v1410_v54  ;;  %v1980_v4 = vpop.permute.xlu0 %1979 }
 0x2ce   : > { %1553 = vmatpush1.msra.mxu1 %v1409_v56  ;;  %v2090_v56 = vmul.f32 %v2087_v32, %v2930_v57 }
 0x2cf   : > { %2435 = vmatprep.subr.msk.mxu0 %vm315_vm0, %v1608_v6  ;;  %v1700_v10 = vpop.permute.xlu1 %1699  ;;  %2433 = vmatmul.mubr.msk.f32.vlgmr.msra.gmra.mxu1 %vm1432_vm10, %v1413_v58 }
 0x2d0   : > { %v1702_v25 = vsel %vm722_vm5, %v1696_v27, %v1700_v10  ;;  %v1704_v26 = vsel %vm722_vm5, %v1700_v10, %v1696_v27  ;;  %2436 = vmatpush1.msk.msra.mxu0 %vm315_vm0, %v1607_v3  ;;  %1784 = vmatprep.mubr.f32.mxu1 %v2587_v40  ;;  %v1890_v27 = vmul.f32 %v1887_v39, %v2880_v30  ;;  %v2458_v3 = vld [vmem:[%s3305_s6 + $0x20] sm:$0xf] }
 0x2d1   : > { %v1707_v5 = vmul.f32 %v1704_v26, %v2853_v18  ;;  %v1708_v28 = vmul.f32 %v1702_v25, %v2856_v19  ;;  %1650 = vmatprep.subr.mxu0 %v1606_v8  ;;  %v2080_v31 = vpop.permute.xlu0 %2079 }
 0x2d2   : > { %1651 = vmatpush1.msra.mxu0 %v1605_v7 }
 0x2d3   : > { %2439 = vmatprep.subr.msk.mxu1 %vm315_vm0, %v1708_v28  ;;  %2443 = vmatprep.subr.msk.mxu0 %vm315_vm0, %v3041_v63  ;;  %v1884_v36 = vpop.permute.xlu1 %1883  ;;  %v2438_v63 = vld [vmem:[%s3305_s6 + $0xc] sm:$0xf] }
 0x2d4   : > { %v1886_v41 = vsel %vm929_vm6, %v1880_v59, %v1884_v36  ;;  %v1888_v43 = vsel %vm929_vm6, %v1884_v36, %v1880_v59  ;;  %2437 = vmatmul.mubr.msk.f32.vlgmr.msra.gmra.mxu0 %vm1432_vm10, %v2434_v12  ;;  %2440 = vmatpush1.msk.msra.mxu1 %vm315_vm0, %v1707_v5  ;;  %v2454_v59 = vld [vmem:[%s3305_s6 + $0x1c] sm:$0xf] }
 0x2d5   : > { %v1891_v18 = vmul.f32 %v1886_v41, %v2877_v29  ;;  %v1892_v19 = vmul.f32 %v1888_v43, %v2880_v30  ;;  %2444 = vmatpush1.msk.msra.mxu0 %vm315_vm0, %v3033_v48  ;;  %1750 = vmatprep.subr.mxu1 %v1706_v35  ;;  %v1985_v48 = vsel %vm1042_vm7, %v3082_v16, %v3084_v17  ;;  %v2180_v50 = vpop.permute.xlu0 %2179 }
 0x2d6   : > { %1834 = vmatprep.subr.mxu0 %v3005_v38  ;;  %1751 = vmatpush1.msra.mxu1 %v1705_v13  ;;  %v1987_v38 = vsel %vm1042_vm7, %v3084_v17, %v3082_v16  ;;  %v2446_v16 = vld [vmem:[%s3305_s6 + $0x14] sm:$0xf]  ;;  %v1989_v17 = vmul.f32 %v1985_v48, %v2896_v37 }
 0x2d7   : > { %1835 = vmatpush1.msra.mxu0 %v3003_v34  ;;  %2447 = vmatprep.subr.msk.mxu1 %vm315_vm0, %v1892_v19  ;;  %v1984_v14 = vpop.permute.xlu1 %1983  ;;  %v1889_v34 = vmul.f32 %v1885_v45, %v2877_v29  ;;  %v1990_v24 = vmul.f32 %v1987_v38, %v2905_v42 }
 0x2d8   : > { %v1986_v15 = vsel %vm1042_vm7, %v1980_v4, %v1984_v14  ;;  %v1988_v30 = vsel %vm1042_vm7, %v1984_v14, %v1980_v4  ;;  %2441 = vmatmul.mubr.msk.f32.vlgmr.msra.gmra.mxu1 %vm1432_vm10, %v2438_v63  ;;  %1868 = vmatprep.mubr.f32.mxu0 %v2587_v40 }
 0x2d9   : > { %v1991_v21 = vmul.f32 %v1986_v15, %v2896_v37  ;;  %v1992_v49 = vmul.f32 %v1988_v30, %v2905_v42  ;;  %2448 = vmatpush1.msk.msra.mxu1 %vm315_vm0, %v1891_v18  ;;  %2445 = vmatmul.mubr.msk.f32.vlgmr.msra.gmra.mxu0 %vm1432_vm10, %v2442_v22  ;;  %v2450_v37 = vld [vmem:[%s3305_s6 + $0x18] sm:$0xf]  ;;  %v2085_v42 = vsel %vm1155_vm8, %v3086_v20, %v3088_v23 }
 0x2da   : > { %1934 = vmatprep.subr.mxu1 %v1890_v27  ;;  %1968 = vmatprep.mubr.f32.mxu1 %v2587_v40  ;;  %v2089_v20 = vmul.f32 %v2085_v42, %v2922_v52 }
 0x2db   : > { %1935 = vmatpush1.msra.mxu1 %v1889_v34  ;;  %2451 = vmatprep.subr.msk.mxu0 %vm315_vm0, %v1992_v49  ;;  %v2084_v29 = vpop.permute.xlu1 %2083 }
 0x2dc   : > { %v2086_v33 = vsel %vm1155_vm8, %v2080_v31, %v2084_v29  ;;  %v2088_v44 = vsel %vm1155_vm8, %v2084_v29, %v2080_v31  ;;  %2452 = vmatpush1.msk.msra.mxu0 %vm315_vm0, %v1991_v21  ;;  %2449 = vmatmul.mubr.msk.f32.vlgmr.msra.gmra.mxu1 %vm1432_vm10, %v2446_v16 }
 0x2dd   : > { %v2091_v51 = vmul.f32 %v2086_v33, %v2922_v52  ;;  %v2092_v53 = vmul.f32 %v2088_v44, %v2930_v57  ;;  %2034 = vmatprep.subr.mxu0 %v1990_v24  ;;  %2068 = vmatprep.mubr.f32.mxu0 %v2587_v40  ;;  %v2178_v52 = vpop.permute.xlu0 %2177 }
 0x2de   : > { %2035 = vmatpush1.msra.mxu0 %v1989_v17  ;;  %2168 = vmatprep.mubr.f32.mxu1 %v2587_v40  ;;  %v2523_v17 = vld [vmem:[%s2695_s21] sm:$0xff]  ;;  %s2530_s21 = scalar_lea.vmem %s2529_s22, 256 }
 0x2df   : > { %2455 = vmatprep.subr.msk.mxu1 %vm315_vm0, %v2092_v53  ;;  %v2184_v54 = vpop.permute.xlu1 %2183  ;;  %2453 = vmatmul.mubr.msk.f32.vlgmr.msra.gmra.mxu0 %vm1432_vm10, %v2450_v37  ;;  %p2532_p1 = scmp.lt.s32.totalorder %s2530_s21, %s2524_s25 }
 0x2e0   : > { %v2186_v23 = vsel %vm1268_vm9, %v2180_v50, %v2184_v54  ;;  %v2188_v47 = vsel %vm1268_vm9, %v2184_v54, %v2180_v50  ;;  %2456 = vmatpush1.msk.msra.mxu1 %vm315_vm0, %v2091_v51  ;;  %2268 = vmatprep.mubr.f32.mxu0 %v2587_v40 }
 0x2e1   : > { %v2191_v57 = vmul.f32 %v2953_v0, %v2186_v23  ;;  %v2192_v60 = vmul.f32 %v2959_v2, %v2188_v47  ;;  %2134 = vmatprep.subr.mxu1 %v2090_v56  ;;  %p2533_p2 = por %p2532_p1, %p2531_p0 }
 0x2e2   : > { %2135 = vmatpush1.msra.mxu1 %v2089_v20 }
 0x2e3   : > { %2459 = vmatprep.subr.msk.mxu0 %vm315_vm0, %v2192_v60  ;;  %v2182_v61 = vpop.permute.xlu1 %2181  ;;  %2457 = vmatmul.mubr.msk.f32.vlgmr.msra.gmra.mxu1 %vm1432_vm10, %v2454_v59  ;;  %p2534_p3 = pnand %p2533_p2, %p2527_p13 }
 0x2e4   : > { %v2185_v62 = vsel %vm1268_vm9, %v2178_v52, %v2182_v61  ;;  %v2187_v55 = vsel %vm1268_vm9, %v2182_v61, %v2178_v52  ;;  %2460 = vmatpush1.msk.msra.mxu0 %vm315_vm0, %v2191_v57 }
 0x2e5   : > { %v2189_v40 = vmul.f32 %v2953_v0, %v2185_v62  ;;  %v2190_v58 = vmul.f32 %v2959_v2, %v2187_v55 }
 0x2e6   : > { %v2281_v30 = vpop.permute.xlu0 %2280 }
 0x2e7   : > { %2234 = vmatprep.subr.mxu0 %v2190_v58 }
 0x2e8   : > { %2235 = vmatpush1.msra.mxu0 %v2189_v40 }
 0x2e9   : > { %2461 = vmatmul.mubr.msk.f32.vlgmr.msra.gmra.mxu0 %vm1432_vm10, %v2458_v3 }
 0x38b   : > { %v1508_v6 = vpop.f32.mrf.mxu1 }
 0x38d   : > { %v1510_v7 = vpop.f32.mrf.mxu1 }
 0x38f   : > { %v1588_v8 = vpop.f32.mrf.mxu1 }
 0x390   : > { %v1589_v9 = vadd.f32 %v1588_v8, %v1508_v6 }
 0x391   : > { %v1590_v46 = vpop.f32.mrf.mxu1 }
 0x392   : > { %v1591_v10 = vadd.f32 %v1590_v46, %v1510_v7 }
 0x394   : > { %v1686_v11 = vpop.f32.mrf.mxu0 }
 0x395   : > { %v1691_v25 = vadd.f32 %v1686_v11, %v1589_v9 }
 0x396   : > { %v1688_v26 = vpop.f32.mrf.mxu0 }
 0x397   : > { %v1692_v0 = vadd.f32 %v1688_v26, %v1591_v10 }
 0x398   : > { %v1786_v4 = vpop.f32.mrf.mxu1 }
 0x399   : > { %v1791_v2 = vadd.f32 %v1786_v4, %v1691_v25  ;;  %v1870_v5 = vpop.f32.mrf.mxu0 }
 0x39a   : > { %v1788_v28 = vpop.f32.mrf.mxu1 }
 0x39b   : > { %v1792_v12 = vadd.f32 %v1788_v28, %v1692_v0  ;;  %v1875_v13 = vadd.f32 %v1870_v5, %v1791_v2  ;;  %v1872_v35 = vpop.f32.mrf.mxu0 }
 0x39c   : > { %v1970_v36 = vpop.f32.mrf.mxu1 }
 0x39d   : > { %v1876_v39 = vadd.f32 %v1872_v35, %v1792_v12  ;;  %v1975_v41 = vadd.f32 %v1970_v36, %v1875_v13 }
 0x39e   : > { %v1972_v43 = vpop.f32.mrf.mxu1 }
 0x39f   : > { %v2070_v18 = vpop.f32.mrf.mxu0  ;;  %v1976_v63 = vadd.f32 %v1972_v43, %v1876_v39 }
 0x3a0   : > { %v2075_v45 = vadd.f32 %v2070_v18, %v1975_v41 }
 0x3a1   : > { %v2072_v22 = vpop.f32.mrf.mxu0 }
 0x3a2   : > { %v2076_v48 = vadd.f32 %v2072_v22, %v1976_v63 }
 0x3a3   : > { %v2170_v19 = vpop.f32.mrf.mxu1 }
 0x3a4   : > { %v2175_v31 = vadd.f32 %v2170_v19, %v2075_v45 }
 0x3a5   : > { %v2172_v27 = vpop.f32.mrf.mxu1 }
 0x3a6   : > { %v2176_v38 = vadd.f32 %v2172_v27, %v2076_v48 }
 0x3a9   : > { %v2270_v14 = vpop.f32.mrf.mxu0 }
 0x3aa   : > { %v2275_v15 = vadd.f32 %v2270_v14, %v2175_v31 }
 0x3ab   : > { %v2272_v34 = vpop.f32.mrf.mxu0 }
 0x3ac   : > { %v2283_v21 = vadd.f32 %v2281_v30, %v2275_v15  ;;  %v2276_v49 = vadd.f32 %v2272_v34, %v2176_v38 }
 0x3ae   : > { %v2284_v16 = vadd.f32 %v2281_v30, %v2276_v49  ;;  %v2285_v24 = vadd.f32 %v2523_v17, %v2283_v21 }
 0x3b0   : > { %v2286_v29 = vadd.f32 %v2284_v16, %v2698_v1 }
 0x3b2   : > { %v2289_v32 = vcombine.low %v2285_v24, %v2286_v29 }
 0x3b4   : > { %2291 = vst [vmem:[%s299_s10] sm:$0xff] %v2289_v32 }
 0x3b5   : > { %2537 = shalt.err (!%p2534_p3)
}
 0x3b6   : > { %s2538_s23 = scalar_lea.hbm %s2305_s18, 128  ;;  %s2542_s17 = scalar_lea.hbm %s3307_s8, 256 }
 0x3b7   : > { %p2539_p4 = scmp.ne.s32.totalorder %s2305_s18, %s2538_s23  ;;  %p2543_p9 = scmp.lt.s32.totalorder %s2305_s18, %s3307_s8 }
 0x3b8   : > { %p2544_p10 = scmp.lt.s32.totalorder %s2542_s17, %s2538_s23 }
 0x3b9   : > { %p2540_p7 = pnand %p2539_p4, %p2681_p5 }
 0x3ba   : > { %p2545_p11 = por %p2544_p10, %p2543_p9 }
 0x3bb   : > { %p2541_p8 = pneg %p2540_p7 }
 0x3bd   : > { %p2546_p12 = pnand %p2545_p11, %p2541_p8 }
 0x3bf   : > { %2549 = shalt.err (!%p2546_p12)
}
 0x3c0   : > { %2468 = dma.vmem_to_hbm [thread:$0]  (%p2681_p5), %s2308_s26, 128, %s2305_s18, %s2293_s24  }
 0x3c1 PF: > { %p2474_p13 = scmp.ge.s32.totalorder %s2584_s30, 2  ;;  %s2319_s20 = sand.u32 1, %s2572_s27  }
 0x3c2   : > { %s2320_s25 = scalar_lea.sflag [#allocation3], %s2319_s20 }
 0x3c3   : > { %p2471_p0 = pnand %p2474_p13, %p2685_p6 }
 0x3c5   : > { %p2472_p1 = pneg %p2471_p0 }
 0x3c7   : > { %2567 = dma.done.wait (%p2472_p1), %s2320_s25, 128  }
 0x3c8   : > { %2569 = vsyncadd (%p2472_p1), %s2320_s25, 4294967168  ;;  %p18_p2 = scmp.ge.s32.totalorder %s2668_s11, 4   ;;  %s3322_s27 = smov %s2576_s28 }
 0x3c9   : > { %s3323_s28 = smov %s2580_s29  ;;  %s3324_s29 = smov %s2679_s14 }
 0x3ca   : > { %s3325_s30 = smov %s2668_s11  ;;  %20 = sbr.rel (!%p18_p2) target bundleno = 3 (0x3), region = 103 }
 0x3cf   :  { %2325 = vsyncpa [#allocation3], 1 }
 0x3d0   :  { %2327 = vsyncpa [#allocation3 + $0x1], 1 }

</bundles_post_ra>
